<compile_context>
chip_gen: v7x
topology: tpu7x:2x2x1
jax: 0.10.0
libtpu: 0.0.40
codegen_flags: <defaults>
</compile_context>

<pallas_src>
import functools

import jax
import jax.numpy as jnp
from jax import lax
from jax.experimental import pallas as pl
from jax.experimental.pallas import tpu as pltpu


def fused_mbconv_kernel(x_ref, w1_ref, p_ref, o_ref, *,
                        N, H, W, Cin, Cexp, Cout, Cred, ks):
    HW = H * W
    c0 = 1  # column layout of the packed f32 parameter slab (see wrapper)

    # ---- unpack the single packed f32 parameter slab (static sub-block loads) ----
    bn1b = p_ref[0:Cexp, 0:1]                                          # (Cexp, 1)
    sew1 = p_ref[0:Cexp, c0:c0 + Cred]                                 # (Cexp, Cred), 1/HW folded
    seb1 = p_ref[Cexp:Cexp + 1, c0:c0 + Cred]                          # (1, Cred)
    sew2 = p_ref[0:Cexp, c0 + Cred:c0 + 2 * Cred]                      # (Cexp, Cred)  (= se_w2^T)
    seb2 = p_ref[0:Cexp, c0 + 2 * Cred:c0 + 2 * Cred + 1]              # (Cexp, 1)
    bn2b = p_ref[0:Cout, c0 + 2 * Cred + 1:c0 + 2 * Cred + 2]          # (Cout, 1)
    w2f = p_ref[0:Cout, c0 + 2 * Cred + 2:c0 + 2 * Cred + 2 + Cexp]    # (Cout, Cexp) f32

    w1 = w1_ref[...]                                                   # (Cexp, ks*ks*Cin) bf16

    # Column-edge masks (vertical edges are handled by the zero H-padding rows).
    col = lax.broadcasted_iota(jnp.int32, (Cin, HW), 1) % W
    not_left = col != 0
    not_right = col != (W - 1)

    # Tiny identity used for a relayout-free (Cexp,1) -> (1,Cexp) "transpose" of the SE gate.
    eye = (lax.broadcasted_iota(jnp.int32, (Cexp, Cexp), 0) ==
           lax.broadcasted_iota(jnp.int32, (Cexp, Cexp), 1)).astype(jnp.float32)

    outs = []
    for n in range(N):  # N=2, fully unrolled: single kernel step, single DMA set
        xs = x_ref[n * Cin:(n + 1) * Cin, :]              # (Cin, SLAB) f32
        center_f32 = xs[:, W + 1:W + 1 + HW]              # (Cin, HW) f32: center tap + residual
        xs_bf = xs.astype(jnp.bfloat16)                   # early bf16 for the im2col taps

        # In-kernel im2col: each 3x3 tap is a static lane-offset slice of the padded slab.
        taps = []
        for kh in range(ks):
            for kw in range(ks):
                if kh == ks // 2 and kw == ks // 2:
                    t = center_f32.astype(jnp.bfloat16)   # reuse f32 center slice
                else:
                    t = xs_bf[:, kh * W + kw: kh * W + kw + HW]
                if kw == 0:
                    t = jnp.where(not_left, t, 0.0)
                elif kw == ks - 1:
                    t = jnp.where(not_right, t, 0.0)
                taps.append(t)
        patches = jnp.concatenate(taps, axis=0)           # (ks*ks*Cin, HW) bf16

        # Fused 3x3 "expand" conv (BN1 scale pre-folded into w1) on the MXU, bf16 -> f32 acc.
        h = jnp.dot(w1, patches, preferred_element_type=jnp.float32)   # (Cexp, HW)
        h = h + bn1b
        h = h * jax.nn.sigmoid(h)                         # SiLU, f32 (v5e-safe VPU/EUP)
        h_bf = h.astype(jnp.bfloat16)                     # cast now; overlaps SE chain

        # Squeeze-Excite entirely on VPU/XLU/EUP (f32); 1/HW is folded into sew1.
        pooled = jnp.sum(h, axis=-1, keepdims=True)                           # (Cexp, 1)
        s = jnp.sum(pooled * sew1, axis=0, keepdims=True) + seb1              # (1, Cred)
        s = s * jax.nn.sigmoid(s)                                             # SiLU
        g = jax.nn.sigmoid(jnp.sum(sew2 * s, axis=-1, keepdims=True) + seb2)  # (Cexp, 1)

        # Fold the per-channel gate into the project weight (exact reassociation):
        #   y = (w2 * g^T) @ h  instead of  w2 @ (g * h).
        gT = jnp.sum(g * eye, axis=0, keepdims=True)      # (1, Cexp), no reshape/transpose
        w2g = (w2f * gT).astype(jnp.bfloat16)             # (Cout, Cexp)

        y = jnp.dot(w2g, h_bf, preferred_element_type=jnp.float32)    # (Cout, HW)
        y = y + bn2b + center_f32                         # BN2 bias + residual (f32 center tap)
        outs.append(y)

    o_ref[...] = jnp.concatenate(outs, axis=0).astype(o_ref.dtype)    # (N*Cout, HW), dense store


def fused_mbconv_block(x_nchw, params, kernel_size=3):
    N, Cin, H, W = x_nchw.shape
    assert kernel_size == 3, "kernel specialized for the 3x3 fused conv"
    w1 = params["w1"]                         # (Cexp, ks*ks*Cin) bf16, BN1 scale folded
    Cexp, K = w1.shape
    assert K == kernel_size * kernel_size * Cin
    w2 = params["w2"]                         # (Cout, Cexp) f32, BN2 scale folded
    Cout = w2.shape[0]
    Cred = params["se_w1"].shape[1]
    assert Cin == Cout, "residual path requires stride==1 and in_channels==out_channels"
    HW = H * W
    SLAB = (H + 2) * W + 2

    # Glue: zero-pad H by 1 row each side, flatten spatial, pad 1 element on each flat
    # end so every 3x3 tap is a static in-bounds lane slice inside the kernel.
    xp = jnp.pad(x_nchw, ((0, 0), (0, 0), (1, 1), (0, 0)))
    xslab = jnp.pad(xp.reshape(N, Cin, (H + 2) * W), ((0, 0), (0, 0), (1, 1)))
    xslab = xslab.reshape(N * Cin, SLAB)

    # Pack all small f32 parameters (and the f32 project weight) into ONE slab -> 1 DMA.
    c0 = 1
    PROWS = Cexp + 1
    PCOLS = c0 + 2 * Cred + 2 + Cexp
    pslab = jnp.zeros((PROWS, PCOLS), jnp.float32)
    pslab = pslab.at[0:Cexp, 0].set(params["bn1_bias"])
    pslab = pslab.at[0:Cexp, c0:c0 + Cred].set(params["se_w1"] * (1.0 / HW))   # fold 1/HW
    pslab = pslab.at[Cexp, c0:c0 + Cred].set(params["se_b1"])
    pslab = pslab.at[0:Cexp, c0 + Cred:c0 + 2 * Cred].set(params["se_w2"])
    pslab = pslab.at[0:Cexp, c0 + 2 * Cred].set(params["se_b2"])
    pslab = pslab.at[0:Cout, c0 + 2 * Cred + 1].set(params["bn2_bias"])
    pslab = pslab.at[0:Cout, c0 + 2 * Cred + 2:c0 + 2 * Cred + 2 + Cexp].set(w2)

    kernel = functools.partial(fused_mbconv_kernel, N=N, H=H, W=W, Cin=Cin,
                               Cexp=Cexp, Cout=Cout, Cred=Cred, ks=kernel_size)

    # Single kernel step: batch is unrolled in-body (one set of DMAs, no per-sample
    # pipeline overhead).  TODO(synk): on v7x, switch to a batch grid axis marked
    # pltpu.CORE_PARALLEL to shard the samples across both TensorCores.
    out = pl.pallas_call(
        kernel,
        out_shape=jax.ShapeDtypeStruct((N * Cout, HW), x_nchw.dtype),
        grid=(1,),
        in_specs=[
            pl.BlockSpec((N * Cin, SLAB), lambda i: (0, 0)),   # H-padded flat input slab
            pl.BlockSpec((Cexp, K), lambda i: (0, 0)),         # fused-conv weight, bf16
            pl.BlockSpec((PROWS, PCOLS), lambda i: (0, 0)),    # packed f32 params + w2
        ],
        out_specs=pl.BlockSpec((N * Cout, HW), lambda i: (0, 0)),   # (8, 256) dense store
        compiler_params=pltpu.CompilerParams(dimension_semantics=("arbitrary",)),
    )(xslab, w1, pslab)

    # (N*Cout, HW) is NCHW-flattened; reshape only, no transpose.
    return out.reshape(N, Cout, H, W)


def reference_nchw(x_nchw, w1_hwio, bn1, se, w2, bn2, eps=1e-5):
    """Pure-JAX (non-Pallas) reference of the same forward pass, NCHW in/out."""
    x = jnp.transpose(x_nchw, (0, 2, 3, 1))
    h = lax.conv_general_dilated(x, w1_hwio, (1, 1), "SAME",
                                 dimension_numbers=("NHWC", "HWIO", "NHWC"))
    h = (h - bn1["mean"]) * (bn1["gamma"] / jnp.sqrt(bn1["var"] + eps)) + bn1["beta"]
    h = h * jax.nn.sigmoid(h)
    pooled = jnp.mean(h, axis=(1, 2), keepdims=True)
    s = jnp.einsum("nabc,cr->nabr", pooled, se["w1"]) + se["b1"]
    s = s * jax.nn.sigmoid(s)
    s = jnp.einsum("nabr,rc->nabc", s, se["w2"]) + se["b2"]
    s = jax.nn.sigmoid(s)
    h = h * s
    y = jnp.einsum("nhwc,co->nhwo", h, w2)
    y = (y - bn2["mean"]) * (bn2["gamma"] / jnp.sqrt(bn2["var"] + eps)) + bn2["beta"]
    y = x + y
    return jnp.transpose(y, (0, 3, 1, 2))


if __name__ == "__main__":
    N, Cin, H, W = 2, 4, 16, 16
    ks = 3
    expand_ratio = 4
    se_ratio = 0.25
    Cout = Cin
    Cexp = int(Cin * expand_ratio)
    Cred = max(1, int(Cexp * se_ratio))
    eps = 1e-5

    keys = jax.random.split(jax.random.PRNGKey(0), 16)
    x_nchw = jax.random.normal(keys[0], (N, Cin, H, W), jnp.float32)

    # Deterministic synthetic parameters (shapes follow the PyTorch module).
    w1_hwio = jax.random.normal(keys[1], (ks, ks, Cin, Cexp), jnp.float32) * 0.1
    bn1_gamma = 1.0 + 0.1 * jax.random.normal(keys[2], (Cexp,), jnp.float32)
    bn1_beta = 0.1 * jax.random.normal(keys[3], (Cexp,), jnp.float32)
    bn1_mean = 0.1 * jax.random.normal(keys[4], (Cexp,), jnp.float32)
    bn1_var = 1.0 + 0.1 * jnp.abs(jax.random.normal(keys[5], (Cexp,), jnp.float32))

    se_w1 = jax.random.normal(keys[6], (Cexp, Cred), jnp.float32) * 0.1   # reduce: pooled @ se_w1
    se_b1 = 0.1 * jax.random.normal(keys[7], (Cred,), jnp.float32)
    se_w2 = jax.random.normal(keys[8], (Cred, Cexp), jnp.float32) * 0.1   # expand: s @ se_w2
    se_b2 = 0.1 * jax.random.normal(keys[9], (Cexp,), jnp.float32)

    w2 = jax.random.normal(keys[10], (Cexp, Cout), jnp.float32) * 0.1
    bn2_gamma = 1.0 + 0.1 * jax.random.normal(keys[11], (Cout,), jnp.float32)
    bn2_beta = 0.1 * jax.random.normal(keys[12], (Cout,), jnp.float32)
    bn2_mean = 0.1 * jax.random.normal(keys[13], (Cout,), jnp.float32)
    bn2_var = 1.0 + 0.1 * jnp.abs(jax.random.normal(keys[14], (Cout,), jnp.float32))

    # Fold eval-mode BN into scale/bias, then fold the scales into the conv weights.
    bn1_scale = bn1_gamma / jnp.sqrt(bn1_var + eps)
    bn1_bias = bn1_beta - bn1_mean * bn1_scale
    bn2_scale = bn2_gamma / jnp.sqrt(bn2_var + eps)
    bn2_bias = bn2_beta - bn2_mean * bn2_scale

    w1_t = jnp.transpose(w1_hwio.reshape(ks * ks * Cin, Cexp))            # (Cexp, K), (kh,kw,ci)
    w1_folded = (w1_t * bn1_scale[:, None]).astype(jnp.bfloat16)
    w2_folded = jnp.transpose(w2) * bn2_scale[:, None]                    # (Cout, Cexp) f32

    kparams = {
        "w1": w1_folded,                      # bf16 (Cexp, 36), BN1 scale folded
        "bn1_bias": bn1_bias,                 # (Cexp,)
        "se_w1": se_w1,                       # (Cexp, Cred)
        "se_b1": se_b1,                       # (Cred,)
        "se_w2": jnp.transpose(se_w2),        # (Cexp, Cred)
        "se_b2": se_b2,                       # (Cexp,)
        "w2": w2_folded,                      # f32 (Cout, Cexp), BN2 scale folded
        "bn2_bias": bn2_bias,                 # (Cout,)
    }

    out = fused_mbconv_block(x_nchw, kparams, kernel_size=ks)
    out = jax.block_until_ready(out)

    ref = reference_nchw(
        x_nchw, w1_hwio,
        dict(gamma=bn1_gamma, beta=bn1_beta, mean=bn1_mean, var=bn1_var),
        dict(w1=se_w1, b1=se_b1, w2=se_w2, b2=se_b2),
        w2,
        dict(gamma=bn2_gamma, beta=bn2_beta, mean=bn2_mean, var=bn2_var),
        eps=eps)

    assert out.shape == (N, Cout, H, W)
    # Tolerance accounts for bf16 MXU operands (f32 accumulation).
    assert jnp.allclose(out, ref, rtol=2e-2, atol=2e-2), "Pallas kernel mismatch vs JAX reference"

    print("KERNEL_OK")
</pallas_src>

<mosaic_0001>
module attributes {stable_mosaic.version = 11 : i64} {
  func.func @fused_mbconv_kernel(%arg0: i32, %arg1: memref<8x290xf32, #tpu.memory_space<vmem>>, %arg2: memref<16x36xbf16, #tpu.memory_space<vmem>>, %arg3: memref<17x27xf32, #tpu.memory_space<vmem>>, %arg4: memref<8x256xf32, #tpu.memory_space<vmem>>) attributes {dimension_semantics = [#tpu.dimension_semantics<arbitrary>], iteration_bounds = array<i64: 1>, scalar_prefetch = 0 : i64, scratch_operands = 0 : i64, tpu.core_type = #tpu.core_type<tc>, window_params = [{pipeline_mode = #tpu.pipeline_mode<synchronous>, transform_indices = @transform_0, window_bounds = array<i64: 8, 290>}, {pipeline_mode = #tpu.pipeline_mode<synchronous>, transform_indices = @transform_1, window_bounds = array<i64: 16, 36>}, {pipeline_mode = #tpu.pipeline_mode<synchronous>, transform_indices = @transform_2, window_bounds = array<i64: 17, 27>}, {pipeline_mode = #tpu.pipeline_mode<synchronous>, transform_indices = @transform_3, window_bounds = array<i64: 8, 256>}]} {
    %c0 = arith.constant 0 : index
    %c0_0 = arith.constant 0 : index
    %0 = vector.load %arg3[%c0, %c0_0] : memref<17x27xf32, #tpu.memory_space<vmem>>, vector<16x1xf32>
    %c0_1 = arith.constant 0 : index
    %c1 = arith.constant 1 : index
    %1 = vector.load %arg3[%c0_1, %c1] : memref<17x27xf32, #tpu.memory_space<vmem>>, vector<16x4xf32>
    %c16 = arith.constant 16 : index
    %c1_2 = arith.constant 1 : index
    %2 = vector.load %arg3[%c16, %c1_2] : memref<17x27xf32, #tpu.memory_space<vmem>>, vector<1x4xf32>
    %c0_3 = arith.constant 0 : index
    %c5 = arith.constant 5 : index
    %3 = vector.load %arg3[%c0_3, %c5] : memref<17x27xf32, #tpu.memory_space<vmem>>, vector<16x4xf32>
    %c0_4 = arith.constant 0 : index
    %c9 = arith.constant 9 : index
    %4 = vector.load %arg3[%c0_4, %c9] : memref<17x27xf32, #tpu.memory_space<vmem>>, vector<16x1xf32>
    %c0_5 = arith.constant 0 : index
    %c10 = arith.constant 10 : index
    %5 = vector.load %arg3[%c0_5, %c10] : memref<17x27xf32, #tpu.memory_space<vmem>>, vector<4x1xf32>
    %c0_6 = arith.constant 0 : index
    %c11 = arith.constant 11 : index
    %6 = vector.load %arg3[%c0_6, %c11] : memref<17x27xf32, #tpu.memory_space<vmem>>, vector<4x16xf32>
    %c0_7 = arith.constant 0 : index
    %c0_8 = arith.constant 0 : index
    %7 = vector.load %arg2[%c0_7, %c0_8] : memref<16x36xbf16, #tpu.memory_space<vmem>>, vector<16x36xbf16>
    %8 = tpu.iota {dimensions = array<i32: 1>} : vector<4x256xi32>
    %c16_i32 = arith.constant 16 : i32
    %c0_i32 = arith.constant 0 : i32
    %9 = arith.cmpi eq, %c16_i32, %c0_i32 : i32
    %c1_i32 = arith.constant 1 : i32
    %10 = arith.select %9, %c1_i32, %c16_i32 : i32
    %11 = vector.broadcast %10 : i32 to vector<4x256xi32>
    %12 = arith.remsi %8, %11 : vector<4x256xi32>
    %c0_i32_9 = arith.constant 0 : i32
    %13 = vector.broadcast %c0_i32_9 : i32 to vector<4x256xi32>
    %14 = arith.cmpi ne, %12, %13 : vector<4x256xi32>
    %c0_i32_10 = arith.constant 0 : i32
    %15 = vector.broadcast %c0_i32_10 : i32 to vector<4x256xi32>
    %16 = arith.cmpi slt, %12, %15 : vector<4x256xi32>
    %c0_i32_11 = arith.constant 0 : i32
    %17 = arith.cmpi slt, %10, %c0_i32_11 : i32
    %18 = vector.broadcast %17 : i1 to vector<4x256xi1>
    %19 = vector.broadcast %18 : vector<4x256xi1> to vector<4x256xi1>
    %20 = arith.xori %16, %19 : vector<4x256xi1>
    %21 = arith.andi %20, %14 : vector<4x256xi1>
    %22 = vector.broadcast %10 : i32 to vector<4x256xi32>
    %23 = arith.addi %12, %22 : vector<4x256xi32>
    %24 = arith.select %21, %23, %12 : vector<4x256xi1>, vector<4x256xi32>
    %c0_i32_12 = arith.constant 0 : i32
    %25 = vector.broadcast %c0_i32_12 : i32 to vector<4x256xi32>
    %26 = arith.cmpi ne, %24, %25 : vector<4x256xi32>
    %c15_i32 = arith.constant 15 : i32
    %27 = vector.broadcast %c15_i32 : i32 to vector<4x256xi32>
    %28 = arith.cmpi ne, %24, %27 : vector<4x256xi32>
    %29 = tpu.iota {dimensions = array<i32: 0>} : vector<16x16xi32>
    %30 = tpu.iota {dimensions = array<i32: 1>} : vector<16x16xi32>
    %31 = arith.cmpi eq, %29, %30 : vector<16x16xi32>
    %32 = arith.extui %31 : vector<16x16xi1> to vector<16x16xi32>
    %33 = arith.sitofp %32 : vector<16x16xi32> to vector<16x16xf32>
    %c0_13 = arith.constant 0 : index
    %c0_14 = arith.constant 0 : index
    %34 = vector.load %arg1[%c0_13, %c0_14] : memref<8x290xf32, #tpu.memory_space<vmem>>, vector<4x290xf32>
    %35 = vector.extract_strided_slice %34 {offsets = [0, 17], sizes = [4, 256], strides = [1, 1]} : vector<4x290xf32> to vector<4x256xf32>
    %36 = arith.truncf %34 : vector<4x290xf32> to vector<4x290xbf16>
    %37 = vector.extract_strided_slice %36 {offsets = [0, 0], sizes = [4, 256], strides = [1, 1]} : vector<4x290xbf16> to vector<4x256xbf16>
    %cst = arith.constant 0.000000e+00 : f32
    %38 = arith.truncf %cst : f32 to bf16
    %39 = vector.broadcast %38 : bf16 to vector<4x256xbf16>
    %40 = arith.select %26, %37, %39 : vector<4x256xi1>, vector<4x256xbf16>
    %41 = vector.extract_strided_slice %36 {offsets = [0, 1], sizes = [4, 256], strides = [1, 1]} : vector<4x290xbf16> to vector<4x256xbf16>
    %42 = vector.extract_strided_slice %36 {offsets = [0, 2], sizes = [4, 256], strides = [1, 1]} : vector<4x290xbf16> to vector<4x256xbf16>
    %cst_15 = arith.constant 0.000000e+00 : f32
    %43 = arith.truncf %cst_15 : f32 to bf16
    %44 = vector.broadcast %43 : bf16 to vector<4x256xbf16>
    %45 = arith.select %28, %42, %44 : vector<4x256xi1>, vector<4x256xbf16>
    %46 = vector.extract_strided_slice %36 {offsets = [0, 16], sizes = [4, 256], strides = [1, 1]} : vector<4x290xbf16> to vector<4x256xbf16>
    %cst_16 = arith.constant 0.000000e+00 : f32
    %47 = arith.truncf %cst_16 : f32 to bf16
    %48 = vector.broadcast %47 : bf16 to vector<4x256xbf16>
    %49 = arith.select %26, %46, %48 : vector<4x256xi1>, vector<4x256xbf16>
    %50 = arith.truncf %35 : vector<4x256xf32> to vector<4x256xbf16>
    %51 = vector.extract_strided_slice %36 {offsets = [0, 18], sizes = [4, 256], strides = [1, 1]} : vector<4x290xbf16> to vector<4x256xbf16>
    %cst_17 = arith.constant 0.000000e+00 : f32
    %52 = arith.truncf %cst_17 : f32 to bf16
    %53 = vector.broadcast %52 : bf16 to vector<4x256xbf16>
    %54 = arith.select %28, %51, %53 : vector<4x256xi1>, vector<4x256xbf16>
    %55 = vector.extract_strided_slice %36 {offsets = [0, 32], sizes = [4, 256], strides = [1, 1]} : vector<4x290xbf16> to vector<4x256xbf16>
    %cst_18 = arith.constant 0.000000e+00 : f32
    %56 = arith.truncf %cst_18 : f32 to bf16
    %57 = vector.broadcast %56 : bf16 to vector<4x256xbf16>
    %58 = arith.select %26, %55, %57 : vector<4x256xi1>, vector<4x256xbf16>
    %59 = vector.extract_strided_slice %36 {offsets = [0, 33], sizes = [4, 256], strides = [1, 1]} : vector<4x290xbf16> to vector<4x256xbf16>
    %60 = vector.extract_strided_slice %36 {offsets = [0, 34], sizes = [4, 256], strides = [1, 1]} : vector<4x290xbf16> to vector<4x256xbf16>
    %cst_19 = arith.constant 0.000000e+00 : f32
    %61 = arith.truncf %cst_19 : f32 to bf16
    %62 = vector.broadcast %61 : bf16 to vector<4x256xbf16>
    %63 = arith.select %28, %60, %62 : vector<4x256xi1>, vector<4x256xbf16>
    %64 = tpu.concatenate %40, %41, %45, %49, %50, %54, %58, %59, %63 in 0 : vector<4x256xbf16>, vector<4x256xbf16>, vector<4x256xbf16>, vector<4x256xbf16>, vector<4x256xbf16>, vector<4x256xbf16>, vector<4x256xbf16>, vector<4x256xbf16>, vector<4x256xbf16> -> vector<36x256xbf16>
    %cst_20 = arith.constant dense<0.000000e+00> : vector<16x256xf32>
    %65 = tpu.matmul %7, %64, %cst_20 {dimension_numbers = #tpu.dot_dimension_numbers<[1], [0], [0], [1], [0, 0, 1, 1], [], []>} : vector<16x36xbf16>, vector<36x256xbf16>, vector<16x256xf32> -> vector<16x256xf32>
    %66 = vector.broadcast %0 : vector<16x1xf32> to vector<16x256xf32>
    %67 = arith.addf %65, %66 : vector<16x256xf32>
    %68 = arith.negf %67 : vector<16x256xf32>
    %69 = math.exp %68 : vector<16x256xf32>
    %cst_21 = arith.constant 1.000000e+00 : f32
    %70 = vector.broadcast %cst_21 : f32 to vector<16x256xf32>
    %71 = arith.addf %70, %69 : vector<16x256xf32>
    %72 = arith.divf %70, %71 : vector<16x256xf32>
    %73 = arith.mulf %67, %72 : vector<16x256xf32>
    %74 = arith.truncf %73 : vector<16x256xf32> to vector<16x256xbf16>
    %cst_22 = arith.constant dense<0.000000e+00> : vector<16xf32>
    %75 = vector.multi_reduction <add>, %73, %cst_22 [1] : vector<16x256xf32> to vector<16xf32>
    %76 = vector.shape_cast %75 : vector<16xf32> to vector<16x1xf32>
    %77 = vector.broadcast %76 : vector<16x1xf32> to vector<16x4xf32>
    %78 = arith.mulf %77, %1 : vector<16x4xf32>
    %cst_23 = arith.constant dense<0.000000e+00> : vector<4xf32>
    %79 = vector.multi_reduction <add>, %78, %cst_23 [0] : vector<16x4xf32> to vector<4xf32>
    %80 = vector.shape_cast %79 : vector<4xf32> to vector<1x4xf32>
    %81 = arith.addf %80, %2 : vector<1x4xf32>
    %82 = arith.negf %81 : vector<1x4xf32>
    %83 = math.exp %82 : vector<1x4xf32>
    %cst_24 = arith.constant 1.000000e+00 : f32
    %84 = vector.broadcast %cst_24 : f32 to vector<1x4xf32>
    %85 = arith.addf %84, %83 : vector<1x4xf32>
    %86 = arith.divf %84, %85 : vector<1x4xf32>
    %87 = arith.mulf %81, %86 : vector<1x4xf32>
    %88 = vector.broadcast %87 : vector<1x4xf32> to vector<16x4xf32>
    %89 = arith.mulf %3, %88 : vector<16x4xf32>
    %cst_25 = arith.constant dense<0.000000e+00> : vector<16xf32>
    %90 = vector.multi_reduction <add>, %89, %cst_25 [1] : vector<16x4xf32> to vector<16xf32>
    %91 = vector.shape_cast %90 : vector<16xf32> to vector<16x1xf32>
    %92 = arith.addf %91, %4 : vector<16x1xf32>
    %93 = arith.negf %92 : vector<16x1xf32>
    %94 = math.exp %93 : vector<16x1xf32>
    %cst_26 = arith.constant 1.000000e+00 : f32
    %95 = vector.broadcast %cst_26 : f32 to vector<16x1xf32>
    %96 = arith.addf %95, %94 : vector<16x1xf32>
    %97 = arith.divf %95, %96 : vector<16x1xf32>
    %98 = vector.broadcast %97 : vector<16x1xf32> to vector<16x16xf32>
    %99 = arith.mulf %98, %33 : vector<16x16xf32>
    %cst_27 = arith.constant dense<0.000000e+00> : vector<16xf32>
    %100 = vector.multi_reduction <add>, %99, %cst_27 [0] : vector<16x16xf32> to vector<16xf32>
    %101 = vector.shape_cast %100 : vector<16xf32> to vector<1x16xf32>
    %102 = vector.broadcast %101 : vector<1x16xf32> to vector<4x16xf32>
    %103 = arith.mulf %6, %102 : vector<4x16xf32>
    %104 = arith.truncf %103 : vector<4x16xf32> to vector<4x16xbf16>
    %cst_28 = arith.constant dense<0.000000e+00> : vector<4x256xf32>
    %105 = tpu.matmul %104, %74, %cst_28 {dimension_numbers = #tpu.dot_dimension_numbers<[1], [0], [0], [1], [0, 0, 1, 1], [], []>} : vector<4x16xbf16>, vector<16x256xbf16>, vector<4x256xf32> -> vector<4x256xf32>
    %106 = vector.broadcast %5 : vector<4x1xf32> to vector<4x256xf32>
    %107 = arith.addf %105, %106 : vector<4x256xf32>
    %108 = arith.addf %107, %35 : vector<4x256xf32>
    %c4 = arith.constant 4 : index
    %c0_29 = arith.constant 0 : index
    %109 = vector.load %arg1[%c4, %c0_29] : memref<8x290xf32, #tpu.memory_space<vmem>>, vector<4x290xf32>
    %110 = vector.extract_strided_slice %109 {offsets = [0, 17], sizes = [4, 256], strides = [1, 1]} : vector<4x290xf32> to vector<4x256xf32>
    %111 = arith.truncf %109 : vector<4x290xf32> to vector<4x290xbf16>
    %112 = vector.extract_strided_slice %111 {offsets = [0, 0], sizes = [4, 256], strides = [1, 1]} : vector<4x290xbf16> to vector<4x256xbf16>
    %cst_30 = arith.constant 0.000000e+00 : f32
    %113 = arith.truncf %cst_30 : f32 to bf16
    %114 = vector.broadcast %113 : bf16 to vector<4x256xbf16>
    %115 = arith.select %26, %112, %114 : vector<4x256xi1>, vector<4x256xbf16>
    %116 = vector.extract_strided_slice %111 {offsets = [0, 1], sizes = [4, 256], strides = [1, 1]} : vector<4x290xbf16> to vector<4x256xbf16>
    %117 = vector.extract_strided_slice %111 {offsets = [0, 2], sizes = [4, 256], strides = [1, 1]} : vector<4x290xbf16> to vector<4x256xbf16>
    %cst_31 = arith.constant 0.000000e+00 : f32
    %118 = arith.truncf %cst_31 : f32 to bf16
    %119 = vector.broadcast %118 : bf16 to vector<4x256xbf16>
    %120 = arith.select %28, %117, %119 : vector<4x256xi1>, vector<4x256xbf16>
    %121 = vector.extract_strided_slice %111 {offsets = [0, 16], sizes = [4, 256], strides = [1, 1]} : vector<4x290xbf16> to vector<4x256xbf16>
    %cst_32 = arith.constant 0.000000e+00 : f32
    %122 = arith.truncf %cst_32 : f32 to bf16
    %123 = vector.broadcast %122 : bf16 to vector<4x256xbf16>
    %124 = arith.select %26, %121, %123 : vector<4x256xi1>, vector<4x256xbf16>
    %125 = arith.truncf %110 : vector<4x256xf32> to vector<4x256xbf16>
    %126 = vector.extract_strided_slice %111 {offsets = [0, 18], sizes = [4, 256], strides = [1, 1]} : vector<4x290xbf16> to vector<4x256xbf16>
    %cst_33 = arith.constant 0.000000e+00 : f32
    %127 = arith.truncf %cst_33 : f32 to bf16
    %128 = vector.broadcast %127 : bf16 to vector<4x256xbf16>
    %129 = arith.select %28, %126, %128 : vector<4x256xi1>, vector<4x256xbf16>
    %130 = vector.extract_strided_slice %111 {offsets = [0, 32], sizes = [4, 256], strides = [1, 1]} : vector<4x290xbf16> to vector<4x256xbf16>
    %cst_34 = arith.constant 0.000000e+00 : f32
    %131 = arith.truncf %cst_34 : f32 to bf16
    %132 = vector.broadcast %131 : bf16 to vector<4x256xbf16>
    %133 = arith.select %26, %130, %132 : vector<4x256xi1>, vector<4x256xbf16>
    %134 = vector.extract_strided_slice %111 {offsets = [0, 33], sizes = [4, 256], strides = [1, 1]} : vector<4x290xbf16> to vector<4x256xbf16>
    %135 = vector.extract_strided_slice %111 {offsets = [0, 34], sizes = [4, 256], strides = [1, 1]} : vector<4x290xbf16> to vector<4x256xbf16>
    %cst_35 = arith.constant 0.000000e+00 : f32
    %136 = arith.truncf %cst_35 : f32 to bf16
    %137 = vector.broadcast %136 : bf16 to vector<4x256xbf16>
    %138 = arith.select %28, %135, %137 : vector<4x256xi1>, vector<4x256xbf16>
    %139 = tpu.concatenate %115, %116, %120, %124, %125, %129, %133, %134, %138 in 0 : vector<4x256xbf16>, vector<4x256xbf16>, vector<4x256xbf16>, vector<4x256xbf16>, vector<4x256xbf16>, vector<4x256xbf16>, vector<4x256xbf16>, vector<4x256xbf16>, vector<4x256xbf16> -> vector<36x256xbf16>
    %cst_36 = arith.constant dense<0.000000e+00> : vector<16x256xf32>
    %140 = tpu.matmul %7, %139, %cst_36 {dimension_numbers = #tpu.dot_dimension_numbers<[1], [0], [0], [1], [0, 0, 1, 1], [], []>} : vector<16x36xbf16>, vector<36x256xbf16>, vector<16x256xf32> -> vector<16x256xf32>
    %141 = vector.broadcast %0 : vector<16x1xf32> to vector<16x256xf32>
    %142 = arith.addf %140, %141 : vector<16x256xf32>
    %143 = arith.negf %142 : vector<16x256xf32>
    %144 = math.exp %143 : vector<16x256xf32>
    %cst_37 = arith.constant 1.000000e+00 : f32
    %145 = vector.broadcast %cst_37 : f32 to vector<16x256xf32>
    %146 = arith.addf %145, %144 : vector<16x256xf32>
    %147 = arith.divf %145, %146 : vector<16x256xf32>
    %148 = arith.mulf %142, %147 : vector<16x256xf32>
    %149 = arith.truncf %148 : vector<16x256xf32> to vector<16x256xbf16>
    %cst_38 = arith.constant dense<0.000000e+00> : vector<16xf32>
    %150 = vector.multi_reduction <add>, %148, %cst_38 [1] : vector<16x256xf32> to vector<16xf32>
    %151 = vector.shape_cast %150 : vector<16xf32> to vector<16x1xf32>
    %152 = vector.broadcast %151 : vector<16x1xf32> to vector<16x4xf32>
    %153 = arith.mulf %152, %1 : vector<16x4xf32>
    %cst_39 = arith.constant dense<0.000000e+00> : vector<4xf32>
    %154 = vector.multi_reduction <add>, %153, %cst_39 [0] : vector<16x4xf32> to vector<4xf32>
    %155 = vector.shape_cast %154 : vector<4xf32> to vector<1x4xf32>
    %156 = arith.addf %155, %2 : vector<1x4xf32>
    %157 = arith.negf %156 : vector<1x4xf32>
    %158 = math.exp %157 : vector<1x4xf32>
    %cst_40 = arith.constant 1.000000e+00 : f32
    %159 = vector.broadcast %cst_40 : f32 to vector<1x4xf32>
    %160 = arith.addf %159, %158 : vector<1x4xf32>
    %161 = arith.divf %159, %160 : vector<1x4xf32>
    %162 = arith.mulf %156, %161 : vector<1x4xf32>
    %163 = vector.broadcast %162 : vector<1x4xf32> to vector<16x4xf32>
    %164 = arith.mulf %3, %163 : vector<16x4xf32>
    %cst_41 = arith.constant dense<0.000000e+00> : vector<16xf32>
    %165 = vector.multi_reduction <add>, %164, %cst_41 [1] : vector<16x4xf32> to vector<16xf32>
    %166 = vector.shape_cast %165 : vector<16xf32> to vector<16x1xf32>
    %167 = arith.addf %166, %4 : vector<16x1xf32>
    %168 = arith.negf %167 : vector<16x1xf32>
    %169 = math.exp %168 : vector<16x1xf32>
    %cst_42 = arith.constant 1.000000e+00 : f32
    %170 = vector.broadcast %cst_42 : f32 to vector<16x1xf32>
    %171 = arith.addf %170, %169 : vector<16x1xf32>
    %172 = arith.divf %170, %171 : vector<16x1xf32>
    %173 = vector.broadcast %172 : vector<16x1xf32> to vector<16x16xf32>
    %174 = arith.mulf %173, %33 : vector<16x16xf32>
    %cst_43 = arith.constant dense<0.000000e+00> : vector<16xf32>
    %175 = vector.multi_reduction <add>, %174, %cst_43 [0] : vector<16x16xf32> to vector<16xf32>
    %176 = vector.shape_cast %175 : vector<16xf32> to vector<1x16xf32>
    %177 = vector.broadcast %176 : vector<1x16xf32> to vector<4x16xf32>
    %178 = arith.mulf %6, %177 : vector<4x16xf32>
    %179 = arith.truncf %178 : vector<4x16xf32> to vector<4x16xbf16>
    %cst_44 = arith.constant dense<0.000000e+00> : vector<4x256xf32>
    %180 = tpu.matmul %179, %149, %cst_44 {dimension_numbers = #tpu.dot_dimension_numbers<[1], [0], [0], [1], [0, 0, 1, 1], [], []>} : vector<4x16xbf16>, vector<16x256xbf16>, vector<4x256xf32> -> vector<4x256xf32>
    %181 = vector.broadcast %5 : vector<4x1xf32> to vector<4x256xf32>
    %182 = arith.addf %180, %181 : vector<4x256xf32>
    %183 = arith.addf %182, %110 : vector<4x256xf32>
    %184 = tpu.concatenate %108, %183 in 0 : vector<4x256xf32>, vector<4x256xf32> -> vector<8x256xf32>
    %c0_45 = arith.constant 0 : index
    %c0_46 = arith.constant 0 : index
    %185 = vector.load %arg4[%c0_45, %c0_46] : memref<8x256xf32, #tpu.memory_space<vmem>>, vector<8x256xf32>
    tpu.vector_store %arg4[%c0_45, %c0_46], %184 {strides = array<i32>} : memref<8x256xf32, #tpu.memory_space<vmem>>, vector<8x256xf32>,
    return
  }
  func.func @transform_0(%arg0: i32) -> (i32, i32) {
    %c0_i32 = arith.constant 0 : i32
    %c0_i32_0 = arith.constant 0 : i32
    %c0_i32_1 = arith.constant 0 : i32
    return %c0_i32, %c0_i32_0 : i32, i32
  }
  func.func @transform_1(%arg0: i32) -> (i32, i32) {
    %c0_i32 = arith.constant 0 : i32
    %c0_i32_0 = arith.constant 0 : i32
    %c0_i32_1 = arith.constant 0 : i32
    return %c0_i32, %c0_i32_0 : i32, i32
  }
  func.func @transform_2(%arg0: i32) -> (i32, i32) {
    %c0_i32 = arith.constant 0 : i32
    %c0_i32_0 = arith.constant 0 : i32
    %c0_i32_1 = arith.constant 0 : i32
    return %c0_i32, %c0_i32_0 : i32, i32
  }
  func.func @transform_3(%arg0: i32) -> (i32, i32) {
    %c0_i32 = arith.constant 0 : i32
    %c0_i32_0 = arith.constant 0 : i32
    %c0_i32_1 = arith.constant 0 : i32
    return %c0_i32, %c0_i32_0 : i32, i32
  }
}

</mosaic_0001>

<bundles_post_ra>
// kernel: tpu_custom_call.1
= control target key start
LH: loop header
LB: loop body
LE: loop exit
PB: predicated region body
PF: predicated region fallthrough
CT: control target
= control target key end

     0   :  { %8 = vsyncpa [#allocation3], 0  ;;  %s1763_s0 = inlined_call_operand.hbm [shape: f32[8,290], index: 0, kind: input, shape index: {}]   ;;  %s1764_s1 = inlined_call_operand.hbm [shape: bf16[16,36], index: 1, kind: input, shape index: {}]   ;;  %s1765_s2 = inlined_call_operand.hbm [shape: f32[17,27], index: 2, kind: input, shape index: {}]   ;;  %s1766_s3 = inlined_call_operand.hbm [shape: f32[8,256], index: 3, kind: output, shape index: {}]  }
   0x1   :  { %9 = vsyncpa [#allocation6], 0 }
   0x2   :  { %10 = vsyncpa [#allocation4], 0  ;;  %s1224_s12 = smov [#allocation5]   ;;  %s1130_s16 = scalar_lea.hbm %s1764_s1, 128 }
   0x3   :  { %s26_s13 = sshll.u32 %s1224_s12, 4  ;;  %p1131_p0 = scmp.ne.s32.totalorder %s1764_s1, %s1130_s16  ;;  %s27_s13 = int_to_ptr.vmem [resolvable:$true] %s26_s13 }
   0x4   :  { %p1134_p1 = scmp.lt.u32.totalorder %s1130_s16, %s1764_s1 }
   0x6   :  { %p1136_p2 = pnand %p1134_p1, %p1131_p0 }
   0x8   :  { %1139 = shalt.err (!%p1136_p2)
}
   0x9   :  { %s1140_s21 = scalar_lea.vmem %s27_s13, 128  ;;  %p1145_p4 = scmp.lt.s32.totalorder %s27_s13, %s27_s13 }
   0xa   :  { %p1141_p3 = scmp.ne.s32.totalorder %s27_s13, %s1140_s21  ;;  %p1146_p5 = scmp.lt.s32.totalorder %s1140_s21, %s1140_s21 }
   0xc   :  { %p1147_p6 = por %p1146_p5, %p1145_p4 }
   0xe   :  { %p1148_p7 = pnand %p1147_p6, %p1141_p3 }
  0x10   :  { %1151 = shalt.err (!%p1148_p7)
}
  0x11   :  { %s1225_s22 = smov 64   ;;  %s1226_s23 = smov 4  }
  0x12   :  { %32 = dma.hbm_to_vmem [thread:$0]  %s1764_s1, 128, %s27_s13, [#allocation6], %s1225_s22, %s1225_s22, %s1226_s23  }
  0x13   :  { %s1227_s26 = smov [#allocation2]   ;;  %s1228_s28 = smov [#allocation7]  }
  0x14   :  { %s17_s27 = sshll.u32 %s1227_s26, 4  ;;  %s38_s29 = sshll.u32 %s1228_s28, 4  ;;  %s18_s27 = int_to_ptr.vmem [resolvable:$true] %s17_s27  ;;  %s39_s29 = int_to_ptr.vmem [resolvable:$true] %s38_s29 }
  0x15   :  { %s1152_s5 = scalar_lea.hbm %s1763_s0, 384 }
  0x16   :  { %p1153_p8 = scmp.ne.s32.totalorder %s1763_s0, %s1152_s5  ;;  %p1156_p9 = scmp.lt.u32.totalorder %s1152_s5, %s1763_s0 }
  0x18   :  { %p1158_p10 = pnand %p1156_p9, %p1153_p8 }
  0x1a   :  { %1161 = shalt.err (!%p1158_p10)
}
  0x1b   :  { %s1162_s1 = scalar_lea.vmem %s18_s27, 384  ;;  %p1167_p12 = scmp.lt.s32.totalorder %s18_s27, %s18_s27 }
  0x1c   :  { %p1163_p11 = scmp.ne.s32.totalorder %s18_s27, %s1162_s1  ;;  %p1168_p13 = scmp.lt.s32.totalorder %s1162_s1, %s1162_s1 }
  0x1e   :  { %p1169_p0 = por %p1168_p13, %p1167_p12 }
  0x20   :  { %p1170_p1 = pnand %p1169_p0, %p1163_p11 }
  0x22   :  { %1173 = shalt.err (!%p1170_p1)
}
  0x23   :  { %20 = dma.hbm_to_vmem [thread:$0]  %s1763_s0, 384, %s18_s27, [#allocation3]  }
  0x24   :  { %s1174_s14 = scalar_lea.hbm %s1765_s2, 384 }
  0x25   :  { %p1175_p2 = scmp.ne.s32.totalorder %s1765_s2, %s1174_s14  ;;  %p1178_p3 = scmp.lt.u32.totalorder %s1174_s14, %s1765_s2 }
  0x27   :  { %p1180_p4 = pnand %p1178_p3, %p1175_p2 }
  0x29   :  { %1183 = shalt.err (!%p1180_p4)
}
  0x2a   :  { %s1184_s19 = scalar_lea.vmem %s39_s29, 384  ;;  %p1189_p6 = scmp.lt.s32.totalorder %s39_s29, %s39_s29 }
  0x2b   :  { %p1185_p5 = scmp.ne.s32.totalorder %s39_s29, %s1184_s19  ;;  %p1190_p7 = scmp.lt.s32.totalorder %s1184_s19, %s1184_s19 }
  0x2d   :  { %p1191_p8 = por %p1190_p7, %p1189_p6 }
  0x2f   :  { %p1192_p9 = pnand %p1191_p8, %p1185_p5 }
  0x31   :  { %1195 = shalt.err (!%p1192_p9)
}
  0x32   :  { %s1229_s0 = smov 128   ;;  %s1230_s20 = smov 8  }
  0x33   :  { %44 = dma.hbm_to_vmem [thread:$0]  %s1765_s2, 384, %s39_s29, [#allocation6], %s1229_s0, %s1229_s0, %s1230_s20  }
  0x34   :  { %1218 = dma.done.wait [#allocation3], 384  }
  0x35   :  { %1219 = vsyncadd [#allocation3], 4294966912  ;;  %v63_v0 = vlaneseq }
  0x36   :  { %1220 = dma.done.wait [#allocation6], 512  }
  0x37   :  { %1221 = vsyncadd [#allocation6], 4294966784  ;;  %v1231_v1 = vmov 0   ;;  %v1311_v2 = vand.u32 127, %v63_v0  ;;  %v1315_v3 = vshrl.u32 %v63_v0, 7  ;;  %s1232_s2 = smov 2  }
  0x38   :  { %393 = vmatprep.mubr.bf16.mxu0 %v1231_v1  ;;  %1065 = vset.pattern.permute.xlu0 %v1231_v1  ;;  %s1233_s24 = smov 16   ;;  %s1234_s25 = smov 18   ;;  %v104_v15 = vld [vmem:[#allocation2 + $0x8] sm:$0xf]  ;;  %v105_v16 = vld [vmem:[#allocation2 + $0x10] sm:$0xf] }
  0x39   :  { %1066 = vset.pattern.permute.xlu1 %v1231_v1  ;;  %570 = vmatprep.mubr.bf16.mxu1 %v1231_v1  ;;  %v65_v4 = vadd.s32 128, %v1311_v2  ;;  %v70_v5 = vand.u32 15, %v1311_v2  ;;  %v1320_v7 = vsub.s32 0, %v1315_v3  ;;  %v117_v8 = vsub.s32 4, %v1315_v3  ;;  %s1235_s26 = smov 32   ;;  %s1236_s27 = smov 34  }
  0x3a   :  { %v1334_v17 = vpack.c.bf16 %v104_v15, %v104_v15  ;;  %v1337_v18 = vpack.c.bf16 %v105_v16, %v105_v16  ;;  %v103_v19 = vld [vmem:[#allocation2] sm:$0xf]  ;;  %s1237_s28 = smov 127   ;;  %s1238_s29 = smov 111   ;;  %vm137_vm9 = vcmask 15360   ;;  %vm149_vm15 = vcmask 130048  }
  0x3b   :  { %v77_v6 = vand.u32 15, %v65_v4  ;;  %vm92_vm0 = vcmp.ne.s32.totalorder %v70_v5, 15  ;;  %vm90_vm1 = vcmp.ne.s32.totalorder %v70_v5, 0  ;;  %v1340_v21 = vpack.c.bf16 %v103_v19, %v103_v19  ;;  %s1239_s30 = smov 126   ;;  %s1240_s4 = smov 112  }
  0x3c   :  { %v197_v20 = vrot.slane %v1334_v17, 6  ;;  %v198_v22 = vrot.slane %v1337_v18, 6  ;;  %s1241_s5 = smov 110   ;;  %s1242_s6 = smov 96   ;;  %v279_v53 = vrot.slane %v1337_v18, 2  ;;  %v278_v61 = vrot.slane %v1334_v17, 2 }
  0x3d   :  { %vm93_vm2 = vcmp.ne.s32.totalorder %v77_v6, 15  ;;  %vm91_vm3 = vcmp.ne.s32.totalorder %v77_v6, 0  ;;  %v196_v23 = vrot.slane %v1340_v21, 6  ;;  %s1243_s7 = smov 95   ;;  %v277_v0 = vrot.slane %v1340_v21, 2  ;;  %s1244_s8 = smov 94  }
  0x3e   :  { %vm123_vm4 = vmpackc.low %vm93_vm2, %vm92_vm0  ;;  %vm161_vm0 = vcmask 146432   ;;  %vm173_vm2 = vcmask 261120   ;;  %s1245_s9 = smov 123   ;;  %s1248_s1 = smov 11  }
  0x3f   :  { %v124_v9 = vsel %vm123_vm4, 65537, %v1231_v1  ;;  %vm109_vm5 = vmpackc.low %vm91_vm3, %vm90_vm1  ;;  %s1249_s10 = smov 117  }
  0x40   :  { %v128_v10 = vrot.slane %v124_v9, %v1320_v7  ;;  %v110_v11 = vsel %vm109_vm5, 65537, %v1231_v1  ;;  %v132_v13 = vrot.slane %v124_v9, %v117_v8  ;;  %v1475_v9 = vld [vmem:[#allocation7] sm:$0xff] }
  0x41   :  { %v1327_v12 = vrot.slane %v110_v11, %v1320_v7  ;;  %v1330_v14 = vrot.slane %v110_v11, %v117_v8 }
  0x42   :  { %133 = vrot.lane.b32.xlu0 %v128_v10, %s1232_s2 }
  0x43   :  { %145 = vrot.lane.b32.xlu1 %v1327_v12, %s1233_s24 }
  0x46   :  { %135 = vrot.lane.b32.xlu0 %v132_v13, %s1232_s2 }
  0x47   :  { %147 = vrot.lane.b32.xlu1 %v1330_v14, %s1233_s24 }
  0x4a   :  { %157 = vrot.lane.b32.xlu0 %v128_v10, %s1234_s25 }
  0x4b   :  { %159 = vrot.lane.b32.xlu1 %v132_v13, %s1234_s25 }
  0x4e   :  { %169 = vrot.lane.b32.xlu0 %v1327_v12, %s1235_s26 }
  0x4f   :  { %171 = vrot.lane.b32.xlu1 %v1330_v14, %s1235_s26 }
  0x52   :  { %181 = vrot.lane.b32.xlu0 %v128_v10, %s1236_s27  ;;  %v1477_v10 = vld [vmem:[#allocation7 + $0x8] sm:$0xff] }
  0x53   :  { %183 = vrot.lane.b32.xlu1 %v132_v13, %s1236_s27 }
  0x56   :  { %201 = vrot.lane.b32.xlu0 %v197_v20, %s1237_s28 }
  0x57   :  { %203 = vrot.lane.b32.xlu1 %v198_v22, %s1237_s28 }
  0x5a   :  { %199 = vrot.lane.b32.xlu0 %v196_v23, %s1237_s28 }
  0x5b   :  { %240 = vrot.lane.b32.xlu1 %v1334_v17, %s1238_s29 }
  0x5e   :  { %242 = vrot.lane.b32.xlu0 %v1337_v18, %s1238_s29 }
  0x5f   :  { %238 = vrot.lane.b32.xlu1 %v1340_v21, %s1238_s29 }
  0xb4   :  { %v1353_v24 = vpop.permute.xlu0 %133 }
  0xb5   :  { %vm139_vm6 = vcmp.ne.s16.totalorder %v1353_v24, 0  ;;  %v1356_v25 = vpop.permute.xlu1 %145 }
  0xb6   :  { %v142_v26 = vsel %vm139_vm6, %v1340_v21, 0  ;;  %vm1773_vm7 = vcmp.ne.s16.totalorder %v1356_v25, 0 }
  0xb7   :  { %v211_v27 = vrot.slane %v142_v26, 4  ;;  %v154_v32 = vsel %vm1773_vm7, %v1340_v21, 0  ;;  %vm308_vm7 = vcmask 1043456  }
  0xb8   :  { %v1361_v28 = vpop.permute.xlu0 %135  ;;  %v226_v38 = vrot.slane %v154_v32, 2 }
  0xb9   :  { %vm1775_vm8 = vcmp.ne.s16.totalorder %v1361_v28, 0  ;;  %v1365_v29 = vpop.permute.xlu1 %147  ;;  %214 = vrot.lane.b32.xlu1 %v211_v27, %s1239_s30  ;;  %v1385_v36 = vsel %vm137_vm9, %v1353_v24, %v1361_v28 }
  0xba   :  { %v144_v30 = vsel %vm1775_vm8, %v1337_v18, 0  ;;  %vm153_vm10 = vcmp.ne.s16.totalorder %v1365_v29, 0  ;;  %vm1777_vm12 = vcmp.ne.s16.totalorder %v1385_v36, 0  ;;  %v1415_v47 = vsel %vm149_vm15, %v1356_v25, %v1365_v29 }
  0xbb   :  { %v213_v31 = vrot.slane %v144_v30, 4  ;;  %v156_v34 = vsel %vm153_vm10, %v1337_v18, 0  ;;  %v143_v45 = vsel %vm1777_vm12, %v1334_v17, 0  ;;  %vm1774_vm3 = vcmp.ne.s16.totalorder %v1415_v47, 0 }
  0xbc   :  { %v1375_v33 = vpop.permute.xlu0 %157  ;;  %v228_v37 = vrot.slane %v156_v34, 2  ;;  %v212_v50 = vrot.slane %v143_v45, 4  ;;  %v155_v55 = vsel %vm1774_vm3, %v1334_v17, 0  ;;  %vm1779_vm3 = vcmask 900096  }
  0xbd   :  { %v1380_v35 = vpop.permute.xlu1 %159  ;;  %218 = vrot.lane.b32.xlu0 %v213_v31, %s1239_s30  ;;  %vm163_vm13 = vcmp.ne.s16.totalorder %v1375_v33, 0  ;;  %v227_v57 = vrot.slane %v155_v55, 2  ;;  %vm313_vm8 = vcmask 1045504   ;;  %vm1780_vm12 = vcmask 777216  }
  0xbe   :  { %vm1772_vm11 = vcmp.ne.s16.totalorder %v1380_v35, 0  ;;  %233 = vrot.lane.b32.xlu1 %v228_v37, %s1240_s4  ;;  %v166_v46 = vsel %vm163_vm13, %v1340_v21, 0  ;;  %v1419_v48 = vsel %vm161_vm0, %v1375_v33, %v1380_v35  ;;  %vm185_vm0 = vcmask 277504  }
  0xbf   :  { %v168_v39 = vsel %vm1772_vm11, %v1337_v18, 0  ;;  %v250_v51 = vrot.slane %v166_v46, 6  ;;  %vm164_vm4 = vcmp.ne.s16.totalorder %v1419_v48, 0  ;;  %vm235_vm11 = vcmask 916480  }
  0xc0   :  { %v1391_v40 = vpop.permute.xlu0 %169  ;;  %v252_v41 = vrot.slane %v168_v39, 6  ;;  %v167_v56 = vsel %vm164_vm4, %v1334_v17, 0  ;;  %v96_v48 = vadd.s32 8, %v1315_v3 }
  0xc1   :  { %vm1767_vm14 = vcmp.ne.s16.totalorder %v1391_v40, 0  ;;  %229 = vrot.lane.b32.xlu0 %v226_v38, %s1240_s4  ;;  %v1401_v43 = vpop.permute.xlu1 %171  ;;  %v251_v58 = vrot.slane %v167_v56, 6 }
  0xc2   :  { %v178_v42 = vsel %vm1767_vm14, %v1340_v21, 0  ;;  %vm177_vm1 = vcmp.ne.s16.totalorder %v1401_v43, 0  ;;  %v1431_v54 = vsel %vm173_vm2, %v1391_v40, %v1401_v43  ;;  %v1247_v43 = vmov 0.0  }
  0xc3   :  { %v265_v44 = vrot.slane %v178_v42, 4  ;;  %v180_v49 = vsel %vm177_vm1, %v1337_v18, 0  ;;  %vm1771_vm5 = vcmp.ne.s16.totalorder %v1431_v54, 0 }
  0xc4   :  { %v267_v52 = vrot.slane %v180_v49, 4  ;;  %v179_v59 = vsel %vm1771_vm5, %v1334_v17, 0  ;;  %v1445_v60 = vpop.permute.xlu0 %181  ;;  %vm301_vm5 = vcmask 1041408  }
  0xc5   :  { %257 = vrot.lane.b32.xlu0 %v252_v41, %s1241_s5  ;;  %268 = vrot.lane.b32.xlu1 %v265_v44, %s1242_s6  ;;  %v266_v62 = vrot.slane %v179_v59, 4  ;;  %vm1770_vm9 = vcmp.ne.s16.totalorder %v1445_v60, 0  ;;  %v1451_v63 = vpop.permute.xlu1 %183 }
  0xc6   :  { %v1458_v4 = vsel %vm185_vm0, %v1445_v60, %v1451_v63  ;;  %v190_v5 = vsel %vm1770_vm9, %v1340_v21, 0  ;;  %vm1769_vm2 = vcmp.ne.s16.totalorder %v1451_v63, 0  ;;  %vm1776_vm0 = vcmp.ne.s16.totalorder %v1330_v14, 0 }
  0xc7   :  { %vm1768_vm14 = vcmp.ne.s16.totalorder %v1458_v4, 0  ;;  %v192_v6 = vsel %vm1769_vm2, %v1337_v18, 0  ;;  %vm119_vm2 = vcmp.ne.s16.totalorder %v1327_v12, 0  ;;  %vm1778_vm9 = vcmask 1031168  }
  0xc8   :  { %v191_v8 = vsel %vm1768_vm14, %v1334_v17, 0  ;;  %v202_v13 = vpop.permute.xlu0 %201  ;;  %vm205_vm14 = vcmask 1039360   ;;  %v122_v38 = vsel %vm1776_vm0, %v1334_v17, 0  ;;  %v121_v41 = vsel %vm119_vm2, %v1340_v21, 0 }
  0xc9   :  { %253 = vrot.lane.b32.xlu0 %v250_v51, %s1241_s5  ;;  %216 = vrot.lane.b32.xlu1 %v212_v50, %s1239_s30  ;;  %v204_v11 = vpop.permute.xlu1 %203  ;;  %vm244_vm0 = vcmask 908288  }
  0xca   :  { %v207_v39 = vsel %vm205_vm14, %v202_v13, %v204_v11 }
  0xcb   :  { %v307_v46 = vsel %vm301_vm5, %v122_v38, %v207_v39 }
  0xcc   :  { %v200_v16 = vpop.permute.xlu0 %199 }
  0xcd   :  { %272 = vrot.lane.b32.xlu0 %v267_v52, %s1242_s6  ;;  %284 = vrot.lane.b32.xlu1 %v279_v53, %s1243_s7  ;;  %v241_v15 = vpop.permute.xlu1 %240  ;;  %v206_v42 = vsel %vm205_vm14, %v200_v16, %v202_v13 }
  0xce   :  { %v304_v17 = vsel %vm301_vm5, %v121_v41, %v206_v42 }
  0xd0   :  { %v243_v19 = vpop.permute.xlu0 %242 }
  0xd1   :  { %231 = vrot.lane.b32.xlu0 %v227_v57, %s1240_s4  ;;  %255 = vrot.lane.b32.xlu1 %v251_v58, %s1241_s5  ;;  %v239_v18 = vpop.permute.xlu1 %238  ;;  %v246_v58 = vsel %vm244_vm0, %v241_v15, %v243_v19 }
  0xd2   :  { %v245_v13 = vsel %vm244_vm0, %v239_v18, %v241_v15 }
  0xd5   :  { %282 = vrot.lane.b32.xlu0 %v278_v61, %s1243_s7  ;;  %270 = vrot.lane.b32.xlu1 %v266_v62, %s1242_s6 }
  0xd9   :  { %280 = vrot.lane.b32.xlu0 %v277_v0, %s1243_s7  ;;  %292 = vrot.lane.b32.xlu1 %v190_v5, %s1244_s8 }
  0xdd   :  { %294 = vrot.lane.b32.xlu0 %v191_v8, %s1244_s8  ;;  %296 = vrot.lane.b32.xlu1 %v192_v6, %s1244_s8 }
  0xe1   :  { %338 = vperm.xlu0 %1065, %v1475_v9   ;;  %343 = vperm.xlu1 %1066, %v1477_v10  }
 0x12b   :  { %v215_v20 = vpop.permute.xlu1 %214 }
 0x12f   :  { %v219_v22 = vpop.permute.xlu0 %218 }
 0x130   :  { %v234_v23 = vpop.permute.xlu1 %233 }
 0x133   :  { %v230_v26 = vpop.permute.xlu0 %229 }
 0x137   :  { %v258_v27 = vpop.permute.xlu0 %257  ;;  %v269_v30 = vpop.permute.xlu1 %268 }
 0x13b   :  { %v254_v31 = vpop.permute.xlu0 %253  ;;  %v217_v32 = vpop.permute.xlu1 %216 }
 0x13c   :  { %v221_v44 = vsel %vm1778_vm9, %v215_v20, %v217_v32  ;;  %v222_v45 = vsel %vm1778_vm9, %v217_v32, %v219_v22  ;;  %vm274_vm9 = vcmask 785408  }
 0x13d   :  { %v312_v52 = vsel %vm308_vm7, %v307_v46, %v222_v45  ;;  %v310_v53 = vsel %vm308_vm7, %v304_v17, %v221_v44 }
 0x13f   :  { %v273_v34 = vpop.permute.xlu0 %272  ;;  %v285_v37 = vpop.permute.xlu1 %284 }
 0x143   :  { %v232_v49 = vpop.permute.xlu0 %231  ;;  %v256_v50 = vpop.permute.xlu1 %255 }
 0x144   :  { %v236_v21 = vsel %vm235_vm11, %v230_v26, %v232_v49  ;;  %v237_v51 = vsel %vm235_vm11, %v232_v49, %v234_v23  ;;  %v261_v55 = vsel %vm1779_vm3, %v256_v50, %v258_v27  ;;  %v260_v62 = vsel %vm1779_vm3, %v254_v31, %v256_v50 }
 0x145   :  { %v318_v56 = vsel %vm313_vm8, %v312_v52, %v237_v51  ;;  %v315_v57 = vsel %vm313_vm8, %v310_v53, %v236_v21  ;;  %v325_v0 = vsel %vm301_vm5, %v246_v58, %v261_v55  ;;  %v322_v19 = vsel %vm301_vm5, %v245_v13, %v260_v62 }
 0x146   :  { %361 = vmatprep.subr.bf16.mxu0 %v318_v56  ;;  %vm298_vm3 = vcmask 769024  }
 0x147   :  { %v283_v59 = vpop.permute.xlu0 %282  ;;  %v271_v61 = vpop.permute.xlu1 %270  ;;  %362 = vmatpush1.bf16.msra.mxu0 %v315_v57 }
 0x148   :  { %v288_v5 = vsel %vm1780_vm12, %v283_v59, %v285_v37  ;;  %v276_v6 = vsel %vm274_vm9, %v271_v61, %v273_v34  ;;  %v275_v8 = vsel %vm274_vm9, %v269_v30, %v271_v61  ;;  %v1519_v34 = vld [vmem:[#allocation5] sm:$0xff]  }
 0x149   :  { %v329_v11 = vsel %vm308_vm7, %v325_v0, %v276_v6  ;;  %v327_v26 = vsel %vm308_vm7, %v322_v19, %v275_v8 }
 0x14a   :  { %v334_v16 = vsel %vm313_vm8, %v329_v11, %v288_v5 }
 0x14b   :  { %v281_v20 = vpop.permute.xlu0 %280  ;;  %v293_v22 = vpop.permute.xlu1 %292  ;;  %363 = vmatprep.subr.bf16.mxu0 %v334_v16 }
 0x14c   :  { %v287_v23 = vsel %vm1780_vm12, %v281_v20, %v283_v59  ;;  %vm1781_vm12 = vcmask 293888  }
 0x14d   :  { %v331_v27 = vsel %vm313_vm8, %v327_v26, %v287_v23 }
 0x14e   :  { %364 = vmatpush1.bf16.msra.mxu0 %v331_v27 }
 0x14f   :  { %v295_v30 = vpop.permute.xlu0 %294  ;;  %v297_v31 = vpop.permute.xlu1 %296 }
 0x150   :  { %v299_v32 = vsel %vm298_vm3, %v293_v22, %v295_v30  ;;  %v300_v15 = vsel %vm298_vm3, %v295_v30, %v297_v31 }
 0x151   :  { %1017 = vmatprep.subr.msk.bf16.mxu0 %vm301_vm5, %v300_v15  ;;  %v356_v18 = vsel %vm301_vm5, %v299_v32, 0 }
 0x152   :  { %366 = vmatpush1.bf16.msra.mxu0 %v356_v18 }
 0x155   :  { %1018 = vmatmul.mubr.msk.bf16.vlgmr.msra.gmra.mrb[0].mxu0 %vm1781_vm12, %v1519_v34  ;;  %vm1782_vm12 = vcmask 39944  }
 0x156   :  { %961 = vmatprep.mubr.bf16.mxu0 %v1231_v1 }
 0x160   :  { %v1524_v37 = vpop.permute.xlu0 %338  ;;  %v1526_v39 = vpop.permute.xlu1 %343 }
 0x228   :  { %v395_v38 = vpop.f32.mrb[0].mxu0 }
 0x229   :  { %v397_v41 = vpop.f32.mrb[1].mxu0  ;;  %v396_v42 = vadd.f32 %v395_v38, %v1524_v37 }
 0x22a   :  { %v398_v44 = vadd.f32 %v397_v41, %v1524_v37  ;;  %v399_v45 = vpop.f32.mrb[2].mxu0 }
 0x22b   :  { %v401_v46 = vpop.f32.mrb[3].mxu0  ;;  %v1019_v17 = vmul.f32 -1.442695, %v396_v42  ;;  %v400_v49 = vadd.f32 %v399_v45, %v1526_v39 }
 0x22c   :  { %v1020_v50 = vmul.f32 -1.442695, %v398_v44  ;;  %v402_v21 = vadd.f32 %v401_v46, %v1526_v39 }
 0x22d   :  { %1071 = vpow2.f32 %v1019_v17  ;;  %v1021_v51 = vmul.f32 -1.442695, %v400_v49  ;;  %v1536_v17 = vld [vmem:[#allocation7 + $0x10] sm:$0x1] }
 0x22e   :  { %1073 = vpow2.f32 %v1020_v50  ;;  %v1022_v52 = vmul.f32 -1.442695, %v402_v21 }
 0x22f   :  { %1075 = vpow2.f32 %v1021_v51 }
 0x230   :  { %1077 = vpow2.f32 %v1022_v52 }
 0x237   :  { %v1072_v53 = vpop.eup %1071 }
 0x238   :  { %v1074_v55 = vpop.eup %1073  ;;  %v416_v56 = vadd.f32 1.0, %v1072_v53 }
 0x239   :  { %v1076_v57 = vpop.eup %1075  ;;  %v417_v58 = vadd.f32 1.0, %v1074_v55 }
 0x23a   :  { %v1078_v59 = vpop.eup %1077  ;;  %1079 = vrcp.f32 %v416_v56  ;;  %v418_v61 = vadd.f32 1.0, %v1076_v57 }
 0x23b   :  { %1081 = vrcp.f32 %v417_v58  ;;  %v419_v62 = vadd.f32 1.0, %v1078_v59 }
 0x23c   :  { %1083 = vrcp.f32 %v418_v61 }
 0x23d   :  { %1085 = vrcp.f32 %v419_v62 }
 0x244   :  { %v1080_v0 = vpop.eup %1079 }
 0x245   :  { %v1082_v5 = vpop.eup %1081  ;;  %v428_v6 = vmul.f32 %v1080_v0, %v396_v42 }
 0x246   :  { %v1084_v8 = vpop.eup %1083  ;;  %v429_v11 = vmul.f32 %v1082_v5, %v398_v44 }
 0x247   :  { %v1086_v13 = vpop.eup %1085  ;;  %v430_v16 = vmul.f32 %v1084_v8, %v400_v49 }
 0x248   :  { %v431_v19 = vmul.f32 %v1086_v13, %v402_v21  ;;  %v434_v20 = vadd.f32 %v429_v11, %v428_v6 }
 0x249   :  { %v432_v22 = vpack.c.bf16 %v430_v16, %v428_v6  ;;  %v1246_v6 = vmov 9  }
 0x24a   :  { %435 = vadd.xlane.f32.xlu1 %v434_v20  ;;  %v437_v23 = vadd.f32 %v431_v19, %v430_v16  ;;  %v433_v26 = vpack.c.bf16 %v431_v19, %v429_v11  ;;  %1067 = vset.pattern.permute.xlu0 %v1246_v6 }
 0x24b   :  { %1068 = vset.pattern.permute.xlu1 %v1246_v6 }
 0x24c   :  { %438 = vadd.xlane.f32.xlu0 %v437_v23  ;;  %538 = vmatprep.subr.bf16.mxu1 %v433_v26 }
 0x24d   :  { %539 = vmatpush1.bf16.msra.mxu1 %v432_v22 }
 0x2d7   :  { %v436_v27 = vpop.xlane.xlu1 %435 }
 0x2d8   :  { %v440_v30 = vmul.f32 %v436_v27, %v1475_v9 }
 0x2d9   :  { %v439_v31 = vpop.xlane.xlu0 %438 }
 0x2da   :  { %v441_v32 = vmul.f32 %v439_v31, %v1477_v10  ;;  %v443_v15 = vsel %vm1782_vm12, %v440_v30, 0.0  ;;  %v1549_v30 = vld [vmem:[#allocation2] sm:$0xf0] }
 0x2db   :  { %v1553_v31 = vpack.c.bf16 %v1549_v30, %v1549_v30 }
 0x2dc   :  { %v444_v18 = vsel %vm1782_vm12, %v441_v32, 0.0  ;;  %vm478_vm12 = vcmask 31744   ;;  %v1555_v32 = vld [vmem:[#allocation2 + $0x10] sm:$0xf0] }
 0x2dd   :  { %v445_v38 = vadd.f32 %v444_v18, %v443_v15  ;;  %v603_v18 = vsel %vm139_vm6, %v1553_v31, 0  ;;  %vm97_vm6 = vcmp.eq.s32.totalorder %v1315_v3, %v1311_v2 }
 0x2df   :  { %v446_v41 = vrot.slane %v445_v38, 4 }
 0x2e1   :  { %v447_v42 = vadd.f32 %v446_v41, %v445_v38  ;;  %v1562_v38 = vpack.c.bf16 %v1555_v32, %v1555_v32  ;;  %v636_v41 = vrot.slane %v603_v18, 6 }
 0x2e3   :  { %v448_v44 = vrot.slane %v447_v42, 2  ;;  %v614_v29 = vsel %vm177_vm1, %v1562_v38, 0  ;;  %vm1784_vm1 = vcmp.ne.s16.totalorder %v1361_v28, 0  ;;  %v663_v28 = vrot.slane %v1562_v38, 2 }
 0x2e5   :  { %v449_v45 = vadd.f32 %v448_v44, %v447_v42  ;;  %v1564_v44 = vld [vmem:[#allocation2 + $0x8] sm:$0xf0] }
 0x2e6   :  { %v1572_v24 = vpack.c.bf16 %v1564_v44, %v1564_v44 }
 0x2e7   :  { %v450_v46 = vrot.slane %v449_v45, 1 }
 0x2e9   :  { %v451_v49 = vadd.f32 %v450_v46, %v449_v45  ;;  %v608_v45 = vsel %vm153_vm10, %v1562_v38, 0  ;;  %vm98_vm10 = vcmp.eq.s32.totalorder %v96_v48, %v1311_v2 }
 0x2ea   :  { %v652_v46 = vrot.slane %v608_v45, 4  ;;  %v1652_v45 = vld [vmem:[#allocation7] sm:$0xf] }
 0x2eb   :  { %v452_v50 = vadd.f32 %v451_v49, %v1536_v17  ;;  %v662_v49 = vrot.slane %v1572_v24, 2 }
 0x2ed   :  { %v1023_v21 = vmul.f32 -1.442695, %v452_v50 }
 0x2ef   :  { %1087 = vpow2.f32 %v1023_v21  ;;  %v609_v21 = vsel %vm163_vm13, %v1553_v31, 0  ;;  %vm1783_vm13 = vcmp.ne.s16.totalorder %v1385_v36, 0 }
 0x2f9   :  { %v1088_v51 = vpop.eup %1087 }
 0x2fa   :  { %v456_v52 = vadd.f32 1.0, %v1088_v51  ;;  %v688_v51 = vrot.slane %v614_v29, 6  ;;  %v697_v29 = vrot.slane %v1553_v31, 4 }
 0x2fc   :  { %1089 = vrcp.f32 %v456_v52  ;;  %v698_v52 = vrot.slane %v1572_v24, 4 }
 0x306   :  { %v1090_v53 = vpop.eup %1089 }
 0x307   :  { %v459_v55 = vmul.f32 %v1090_v53, %v452_v50  ;;  %v610_v50 = vsel %vm164_vm4, %v1572_v24, 0  ;;  %v1595_v53 = vsel %vm97_vm6, 1.0, %v1247_v43  ;;  %vm1785_vm4 = vcmp.ne.s16.totalorder %v1415_v47, 0 }
 0x308   :  { %vm1786_vm6 = vcmp.ne.s16.totalorder %v1356_v25, 0 }
 0x309   :  { %v463_v56 = vrot.slane %v459_v55, %v1320_v7  ;;  %v1597_v55 = vsel %vm98_vm10, 1.0, %v1247_v43  ;;  %v606_v36 = vsel %vm1786_vm6, %v1553_v31, 0  ;;  %vm1787_vm10 = vcmp.ne.s16.totalorder %v1380_v35, 0 }
 0x30a   :  { %v611_v47 = vsel %vm1787_vm10, %v1562_v38, 0  ;;  %v699_v35 = vrot.slane %v1562_v38, 4  ;;  %vm1791_vm6 = vcmp.ne.s16.totalorder %v1451_v63, 0  ;;  %v601_v63 = vsel %vm119_vm2, %v1553_v31, 0 }
 0x30b   :  { %465 = vrot.lane.b32.xlu0 %v463_v56, %s1226_s23  ;;  %vm1792_vm10 = vcmp.ne.s16.totalorder %v1458_v4, 0  ;;  %vm1794_vm2 = vcmask 1031168  }
 0x37d   :  { %v466_v57 = vpop.permute.xlu0 %465 }
 0x37e   :  { %v468_v58 = vmul.f32 %v466_v57, %v1475_v9  ;;  %v469_v59 = vmul.f32 %v466_v57, %v1477_v10 }
 0x380   :  { %472 = vrot.lane.b32.xlu1 %v468_v58, %s1245_s9 }
 0x384   :  { %474 = vrot.lane.b32.xlu1 %v469_v59, %s1245_s9 }
 0x3f2   :  { %v473_v61 = vpop.permute.xlu1 %472 }
 0x3f3   :  { %v479_v62 = vsel %vm478_vm12, %v473_v61, 0.0 }
 0x3f4   :  { %480 = vadd.xlane.f32.xlu0 %v479_v62 }
 0x3f6   :  { %v475_v0 = vpop.permute.xlu1 %474 }
 0x3f7   :  { %v482_v5 = vsel %vm478_vm12, %v475_v0, 0.0 }
 0x3f8   :  { %483 = vadd.xlane.f32.xlu1 %v482_v5 }
 0x481   :  { %v481_v8 = vpop.xlane.xlu0 %480 }
 0x482   :  { %v485_v11 = vadd.f32 %v481_v8, %v1475_v9 }
 0x484   :  { %v1024_v13 = vmul.f32 -1.442695, %v485_v11  ;;  %v604_v11 = vsel %vm1783_vm13, %v1572_v24, 0  ;;  %vm1788_vm13 = vcmp.ne.s16.totalorder %v1431_v54, 0 }
 0x485   :  { %v484_v16 = vpop.xlane.xlu1 %483  ;;  %v613_v25 = vsel %vm1788_vm13, %v1572_v24, 0  ;;  %vm1793_vm13 = vcmp.ne.s16.totalorder %v1330_v14, 0 }
 0x486   :  { %1091 = vpow2.f32 %v1024_v13  ;;  %v486_v19 = vadd.f32 %v484_v16, %v1477_v10  ;;  %v637_v13 = vrot.slane %v604_v11, 6  ;;  %v605_v16 = vsel %vm1784_vm1, %v1562_v38, 0 }
 0x487   :  { %vm1789_vm1 = vcmp.ne.s16.totalorder %v1391_v40, 0  ;;  %v602_v12 = vsel %vm1793_vm13, %v1572_v24, 0 }
 0x488   :  { %v1025_v20 = vmul.f32 -1.442695, %v486_v19  ;;  %v638_v19 = vrot.slane %v605_v16, 6 }
 0x48a   :  { %1093 = vpow2.f32 %v1025_v20  ;;  %v607_v20 = vsel %vm1785_vm4, %v1572_v24, 0  ;;  %vm1790_vm4 = vcmp.ne.s16.totalorder %v1445_v60, 0 }
 0x490   :  { %v1092_v22 = vpop.eup %1091 }
 0x491   :  { %v493_v23 = vadd.f32 1.0, %v1092_v22  ;;  %v651_v22 = vrot.slane %v607_v20, 4 }
 0x493   :  { %1095 = vrcp.f32 %v493_v23  ;;  %v650_v23 = vrot.slane %v606_v36, 4 }
 0x494   :  { %v1094_v26 = vpop.eup %1093 }
 0x495   :  { %v494_v27 = vadd.f32 1.0, %v1094_v26  ;;  %v661_v26 = vrot.slane %v1553_v31, 2 }
 0x497   :  { %1097 = vrcp.f32 %v494_v27  ;;  %v687_v27 = vrot.slane %v613_v25, 6 }
 0x49d   :  { %v1096_v15 = vpop.eup %1095 }
 0x49e   :  { %501 = vperm.xlu0 %1067, %v1096_v15   ;;  %v612_v15 = vsel %vm1789_vm1, %v1553_v31, 0  ;;  %vm1795_vm1 = vmmov %vm1794_vm2 }
 0x49f   :  { %v686_v18 = vrot.slane %v612_v15, 6 }
 0x4a1   :  { %v1098_v42 = vpop.eup %1097 }
 0x4a2   :  { %639 = vrot.lane.b32.xlu0 %v636_v41, %s1239_s30  ;;  %506 = vperm.xlu1 %1068, %v1098_v42   ;;  %v615_v41 = vsel %vm1790_vm4, %v1553_v31, 0  ;;  %v617_v42 = vsel %vm1791_vm6, %v1562_v38, 0 }
 0x4a3   :  { %v711_v54 = vrot.slane %v615_v41, 2  ;;  %v713_v40 = vrot.slane %v617_v42, 2 }
 0x4a6   :  { %657 = vrot.lane.b32.xlu0 %v652_v46, %s1240_s4 }
 0x4aa   :  { %666 = vrot.lane.b32.xlu0 %v662_v49, %s1238_s29 }
 0x4ae   :  { %677 = vrot.lane.b32.xlu0 %v610_v50, %s1241_s5 }
 0x4b2   :  { %675 = vrot.lane.b32.xlu0 %v609_v21, %s1241_s5 }
 0x4b6   :  { %693 = vrot.lane.b32.xlu0 %v688_v51, %s1242_s6  ;;  %v620_v51 = vrot.slane %v601_v63, 2 }
 0x4ba   :  { %702 = vrot.lane.b32.xlu0 %v698_v52, %s1243_s7 }
 0x51d   :  { %v502_v33 = vpop.permute.xlu0 %501 }
 0x51e   :  { %v509_v56 = vmul.f32 %v1595_v53, %v502_v33 }
 0x520   :  { %v512_v59 = vsel %vm149_vm15, %v509_v56, 0.0 }
 0x521   :  { %v507_v57 = vpop.permute.xlu1 %506 }
 0x522   :  { %v510_v58 = vmul.f32 %v1597_v55, %v507_v57  ;;  %v621_v57 = vrot.slane %v602_v12, 2 }
 0x524   :  { %v513_v61 = vsel %vm149_vm15, %v510_v58, 0.0 }
 0x525   :  { %v514_v62 = vadd.f32 %v513_v61, %v512_v59 }
 0x527   :  { %v515_v0 = vrot.slane %v514_v62, 4 }
 0x529   :  { %v516_v3 = vadd.f32 %v515_v0, %v514_v62 }
 0x52b   :  { %v517_v5 = vrot.slane %v516_v3, 2 }
 0x52d   :  { %v518_v2 = vadd.f32 %v517_v5, %v516_v3 }
 0x52f   :  { %v519_v6 = vrot.slane %v518_v2, 1 }
 0x531   :  { %v520_v8 = vadd.f32 %v519_v6, %v518_v2 }
 0x533   :  { %522 = vrot.lane.b32.xlu1 %v520_v8, %s1248_s1 }
 0x537   :  { %627 = vrot.lane.b32.xlu1 %v1572_v24, %s1237_s28 }
 0x53b   :  { %629 = vrot.lane.b32.xlu1 %v1562_v38, %s1237_s28  ;;  %v616_v38 = vsel %vm1792_vm10, %v1572_v24, 0 }
 0x53c   :  { %v712_v52 = vrot.slane %v616_v38, 2 }
 0x53f   :  { %625 = vrot.lane.b32.xlu1 %v1553_v31, %s1237_s28  ;;  %v640_v31 = vpop.permute.xlu0 %639 }
 0x543   :  { %641 = vrot.lane.b32.xlu1 %v637_v13, %s1239_s30  ;;  %v658_v3 = vpop.permute.xlu0 %657 }
 0x547   :  { %643 = vrot.lane.b32.xlu1 %v638_v19, %s1239_s30  ;;  %v667_v19 = vpop.permute.xlu0 %666 }
 0x54b   :  { %655 = vrot.lane.b32.xlu1 %v651_v22, %s1240_s4  ;;  %v678_v22 = vpop.permute.xlu0 %677 }
 0x54f   :  { %653 = vrot.lane.b32.xlu1 %v650_v23, %s1240_s4  ;;  %v676_v23 = vpop.permute.xlu0 %675 }
 0x553   :  { %668 = vrot.lane.b32.xlu1 %v663_v28, %s1238_s29 }
 0x557   :  { %679 = vrot.lane.b32.xlu1 %v611_v47, %s1241_s5  ;;  %v694_v47 = vpop.permute.xlu0 %693 }
 0x55b   :  { %664 = vrot.lane.b32.xlu1 %v661_v26, %s1238_s29  ;;  %v703_v26 = vpop.permute.xlu0 %702 }
 0x55f   :  { %691 = vrot.lane.b32.xlu1 %v687_v27, %s1242_s6 }
 0x563   :  { %689 = vrot.lane.b32.xlu1 %v686_v18, %s1242_s6 }
 0x567   :  { %704 = vrot.lane.b32.xlu1 %v699_v35, %s1243_s7 }
 0x56b   :  { %714 = vrot.lane.b32.xlu1 %v711_v54, %s1244_s8 }
 0x56f   :  { %718 = vrot.lane.b32.xlu1 %v713_v40, %s1244_s8 }
 0x5a5   :  { %v523_v46 = vpop.permute.xlu1 %522 }
 0x5a6   :  { %v525_v49 = vmul.f32 %v523_v46, %v1652_v45 }
 0x5a8   :  { %v526_v50 = vpack.c.bf16 %v525_v49, %v525_v49 }
 0x5a9   :  { %v628_v60 = vpop.permute.xlu1 %627 }
 0x5aa   :  { %533 = vrot.lane.b32.xlu0 %v526_v50, %s1249_s10 }
 0x5ad   :  { %v630_v21 = vpop.permute.xlu1 %629 }
 0x5ae   :  { %700 = vrot.lane.b32.xlu0 %v697_v29, %s1243_s7  ;;  %v632_v59 = vsel %vm205_vm14, %v628_v60, %v630_v21 }
 0x5af   :  { %v727_v62 = vsel %vm301_vm5, %v621_v57, %v632_v59 }
 0x5b1   :  { %v626_v48 = vpop.permute.xlu1 %625 }
 0x5b2   :  { %v631_v43 = vsel %vm205_vm14, %v626_v48, %v628_v60  ;;  %716 = vrot.lane.b32.xlu0 %v712_v52, %s1244_s8  ;;  %vm1796_vm14 = vcmask 900096  }
 0x5b3   :  { %v724_v33 = vsel %vm301_vm5, %v620_v51, %v631_v43  ;;  %vm1798_vm4 = vmmov %vm1796_vm14 }
 0x5b4   :  { %v681_v60 = vsel %vm1798_vm4, %v676_v23, %v678_v22 }
 0x5b5   :  { %v642_v56 = vpop.permute.xlu1 %641 }
 0x5b6   :  { %v645_v4 = vsel %vm1794_vm2, %v640_v31, %v642_v56 }
 0x5b7   :  { %v729_v58 = vsel %vm308_vm7, %v724_v33, %v645_v4 }
 0x5b9   :  { %v644_v61 = vpop.permute.xlu1 %643 }
 0x5ba   :  { %v646_v0 = vsel %vm1795_vm1, %v642_v56, %v644_v61 }
 0x5bb   :  { %v731_v14 = vsel %vm308_vm7, %v727_v62, %v646_v0 }
 0x5bd   :  { %v656_v5 = vpop.permute.xlu1 %655 }
 0x5be   :  { %v660_v2 = vsel %vm235_vm11, %v656_v5, %v658_v3 }
 0x5bf   :  { %v736_v24 = vsel %vm313_vm8, %v731_v14, %v660_v2 }
 0x5c0   :  { %760 = vmatprep.subr.bf16.mxu1 %v736_v24 }
 0x5c1   :  { %v654_v6 = vpop.permute.xlu1 %653 }
 0x5c2   :  { %v659_v8 = vsel %vm235_vm11, %v654_v6, %v656_v5  ;;  %vm1797_vm11 = vcmask 777216  }
 0x5c3   :  { %v733_v11 = vsel %vm313_vm8, %v729_v58, %v659_v8  ;;  %vm1799_vm6 = vmmov %vm1797_vm11 }
 0x5c5   :  { %v669_v13 = vpop.permute.xlu1 %668 }
 0x5c6   :  { %v671_v27 = vsel %vm244_vm0, %v667_v19, %v669_v13 }
 0x5c9   :  { %v680_v16 = vpop.permute.xlu1 %679 }
 0x5ca   :  { %v682_v15 = vsel %vm1796_vm14, %v678_v22, %v680_v16 }
 0x5cb   :  { %v743_v41 = vsel %vm301_vm5, %v671_v27, %v682_v15 }
 0x5cd   :  { %v665_v20 = vpop.permute.xlu1 %664 }
 0x5ce   :  { %v670_v42 = vsel %vm244_vm0, %v665_v20, %v667_v19 }
 0x5cf   :  { %v740_v29 = vsel %vm301_vm5, %v670_v42, %v681_v60 }
 0x5d1   :  { %v692_v36 = vpop.permute.xlu1 %691 }
 0x5d2   :  { %v696_v18 = vsel %vm274_vm9, %v692_v36, %v694_v47 }
 0x5d3   :  { %v747_v40 = vsel %vm308_vm7, %v743_v41, %v696_v18 }
 0x5d5   :  { %v690_v28 = vpop.permute.xlu1 %689 }
 0x5d6   :  { %v695_v46 = vsel %vm274_vm9, %v690_v28, %v692_v36  ;;  %vm1800_vm9 = vcmask 293888  }
 0x5d7   :  { %v745_v38 = vsel %vm308_vm7, %v740_v29, %v695_v46 }
 0x5d9   :  { %v705_v25 = vpop.permute.xlu1 %704 }
 0x5da   :  { %v707_v35 = vsel %vm1797_vm11, %v703_v26, %v705_v25 }
 0x5db   :  { %v752_v50 = vsel %vm313_vm8, %v747_v40, %v707_v35 }
 0x5dd   :  { %v715_v49 = vpop.permute.xlu1 %714 }
 0x5e1   :  { %v719_v52 = vpop.permute.xlu1 %718 }
 0x61c   :  { %v534_v54 = vpop.permute.xlu0 %533 }
 0x61d   :  { %1026 = vmatmul.mubr.msk.bf16.vlgmr.msra.gmra.mrb[0].mxu1 %vm149_vm15, %v534_v54 }
 0x61e   :  { %761 = vmatpush1.bf16.msra.mxu1 %v733_v11  ;;  %792 = vmatprep.mubr.bf16.mxu1 %v1231_v1 }
 0x61f   :  { %762 = vmatprep.subr.bf16.mxu1 %v752_v50 }
 0x620   :  { %v701_v63 = vpop.permute.xlu0 %700 }
 0x621   :  { %v706_v21 = vsel %vm1799_vm6, %v701_v63, %v703_v26 }
 0x622   :  { %v749_v51 = vsel %vm313_vm8, %v745_v38, %v706_v21  ;;  %vm1801_vm8 = vcmask 39944  }
 0x623   :  { %763 = vmatpush1.bf16.msra.mxu1 %v749_v51 }
 0x624   :  { %v717_v48 = vpop.permute.xlu0 %716 }
 0x625   :  { %v720_v43 = vsel %vm298_vm3, %v715_v49, %v717_v48  ;;  %v721_v33 = vsel %vm298_vm3, %v717_v48, %v719_v52  ;;  %vm1802_vm3 = vmmov %vm1801_vm8 }
 0x626   :  { %v755_v1 = vsel %vm301_vm5, %v720_v43, 0  ;;  %1027 = vmatprep.subr.msk.bf16.mxu1 %vm301_vm5, %v721_v33 }
 0x627   :  { %765 = vmatpush1.bf16.msra.mxu1 %v755_v1 }
 0x62a   :  { %1028 = vmatmul.mubr.msk.bf16.vlgmr.msra.gmra.mrb[4].mxu1 %vm1800_vm9, %v1519_v34 }
 0x6f0   :  { %v1702_v12 = vpop.f32.mrb[0].mxu1 }
 0x6f1   :  { %v1704_v31 = vpop.f32.mrb[1].mxu1 }
 0x6f2   :  { %v576_v56 = vpop.f32.mrb[2].mxu1 }
 0x6f3   :  { %v577_v4 = vpop.f32.mrb[3].mxu1 }
 0x6fd   :  { %v794_v57 = vpop.f32.mrb[4].mxu1 }
 0x6fe   :  { %v795_v58 = vadd.f32 %v794_v57, %v1524_v37  ;;  %v796_v59 = vpop.f32.mrb[5].mxu1 }
 0x6ff   :  { %v797_v61 = vadd.f32 %v796_v59, %v1524_v37  ;;  %v798_v62 = vpop.f32.mrb[6].mxu1 }
 0x700   :  { %v1029_v0 = vmul.f32 -1.442695, %v795_v58  ;;  %v799_v3 = vadd.f32 %v798_v62, %v1526_v39  ;;  %v800_v5 = vpop.f32.mrb[7].mxu1 }
 0x701   :  { %v1030_v2 = vmul.f32 -1.442695, %v797_v61  ;;  %v801_v34 = vadd.f32 %v800_v5, %v1526_v39 }
 0x702   :  { %1099 = vpow2.f32 %v1029_v0  ;;  %v1031_v14 = vmul.f32 -1.442695, %v799_v3 }
 0x703   :  { %1101 = vpow2.f32 %v1030_v2  ;;  %v1032_v24 = vmul.f32 -1.442695, %v801_v34 }
 0x704   :  { %1103 = vpow2.f32 %v1031_v14 }
 0x705   :  { %1105 = vpow2.f32 %v1032_v24 }
 0x70c   :  { %v1100_v6 = vpop.eup %1099 }
 0x70d   :  { %v1102_v8 = vpop.eup %1101  ;;  %v815_v11 = vadd.f32 1.0, %v1100_v6 }
 0x70e   :  { %v1104_v13 = vpop.eup %1103  ;;  %v816_v16 = vadd.f32 1.0, %v1102_v8 }
 0x70f   :  { %v1106_v37 = vpop.eup %1105  ;;  %1107 = vrcp.f32 %v815_v11  ;;  %v817_v19 = vadd.f32 1.0, %v1104_v13 }
 0x710   :  { %1109 = vrcp.f32 %v816_v16  ;;  %v818_v20 = vadd.f32 1.0, %v1106_v37  ;;  %v1250_v37 = vmov 10  }
 0x711   :  { %1111 = vrcp.f32 %v817_v19 }
 0x712   :  { %1113 = vrcp.f32 %v818_v20 }
 0x719   :  { %v1108_v22 = vpop.eup %1107 }
 0x71a   :  { %v1110_v39 = vpop.eup %1109  ;;  %v827_v36 = vmul.f32 %v1108_v22, %v795_v58 }
 0x71b   :  { %v1112_v23 = vpop.eup %1111  ;;  %v828_v28 = vmul.f32 %v1110_v39, %v797_v61 }
 0x71c   :  { %v1114_v47 = vpop.eup %1113  ;;  %v829_v26 = vmul.f32 %v1112_v23, %v799_v3 }
 0x71d   :  { %v830_v25 = vmul.f32 %v1114_v47, %v801_v34  ;;  %v833_v27 = vadd.f32 %v828_v28, %v827_v36 }
 0x71e   :  { %v831_v15 = vpack.c.bf16 %v829_v26, %v827_v36 }
 0x71f   :  { %834 = vadd.xlane.f32.xlu0 %v833_v27  ;;  %v836_v18 = vadd.f32 %v830_v25, %v829_v26  ;;  %v832_v35 = vpack.c.bf16 %v830_v25, %v828_v28 }
 0x721   :  { %837 = vadd.xlane.f32.xlu1 %v836_v18  ;;  %929 = vmatprep.subr.bf16.mxu0 %v832_v35 }
 0x722   :  { %930 = vmatpush1.bf16.msra.mxu0 %v831_v15  ;;  %v974_v15 = vrot.slane %v1564_v44, 4  ;;  %v975_v44 = vrot.slane %v1555_v32, 4 }
 0x7ac   :  { %v835_v41 = vpop.xlane.xlu0 %834 }
 0x7ad   :  { %v839_v54 = vmul.f32 %v835_v41, %v1475_v9 }
 0x7ae   :  { %v838_v42 = vpop.xlane.xlu1 %837 }
 0x7af   :  { %v840_v40 = vmul.f32 %v838_v42, %v1477_v10  ;;  %v841_v46 = vsel %vm1801_vm8, %v839_v54, 0.0  ;;  %v973_v54 = vrot.slane %v1549_v30, 4  ;;  %v1129_v42 = vld [vmem:[#allocation2 + $0x8] sm:$0xf] }
 0x7b1   :  { %v842_v49 = vsel %vm1802_vm3, %v840_v40, 0.0 }
 0x7b2   :  { %v843_v50 = vadd.f32 %v842_v49, %v841_v46 }
 0x7b4   :  { %v844_v60 = vrot.slane %v843_v50, 4 }
 0x7b6   :  { %v845_v29 = vadd.f32 %v844_v60, %v843_v50 }
 0x7b8   :  { %v846_v63 = vrot.slane %v845_v29, 2 }
 0x7ba   :  { %v847_v38 = vadd.f32 %v846_v63, %v845_v29 }
 0x7bc   :  { %v848_v21 = vrot.slane %v847_v38, 1 }
 0x7be   :  { %v849_v51 = vadd.f32 %v848_v21, %v847_v38 }
 0x7c0   :  { %v850_v52 = vadd.f32 %v849_v51, %v1536_v17 }
 0x7c2   :  { %v1033_v48 = vmul.f32 -1.442695, %v850_v52 }
 0x7c4   :  { %1115 = vpow2.f32 %v1033_v48 }
 0x7ce   :  { %v1116_v43 = vpop.eup %1115 }
 0x7cf   :  { %v854_v33 = vadd.f32 1.0, %v1116_v43 }
 0x7d1   :  { %1117 = vrcp.f32 %v854_v33 }
 0x7db   :  { %v1118_v1 = vpop.eup %1117 }
 0x7dc   :  { %v857_v56 = vmul.f32 %v1118_v1, %v850_v52 }
 0x7de   :  { %v861_v4 = vrot.slane %v857_v56, %v1320_v7 }
 0x7e0   :  { %863 = vrot.lane.b32.xlu0 %v861_v4, %s1226_s23  ;;  %s1251_s23 = smov [#allocation8]  }
 0x7e1   :  { %s1004_s11 = sshll.u32 %s1251_s23, 4  ;;  %s1005_s11 = int_to_ptr.vmem [resolvable:$true] %s1004_s11 }
 0x7e2   :  { %s1196_s12 = scalar_lea.vmem %s1005_s11, 256  ;;  %p1201_p11 = scmp.lt.s32.totalorder %s1005_s11, %s1005_s11 }
 0x7e3   :  { %p1197_p10 = scmp.ne.s32.totalorder %s1005_s11, %s1196_s12  ;;  %p1202_p12 = scmp.lt.s32.totalorder %s1196_s12, %s1196_s12 }
 0x7e5   :  { %p1203_p13 = por %p1202_p12, %p1201_p11 }
 0x7e7   :  { %p1204_p0 = pnand %p1203_p13, %p1197_p10 }
 0x852   :  { %v864_v57 = vpop.permute.xlu0 %863 }
 0x853   :  { %v866_v58 = vmul.f32 %v864_v57, %v1475_v9  ;;  %v867_v59 = vmul.f32 %v864_v57, %v1477_v10 }
 0x855   :  { %872 = vrot.lane.b32.xlu0 %v867_v59, %s1245_s9  ;;  %870 = vrot.lane.b32.xlu1 %v866_v58, %s1245_s9 }
 0x8c7   :  { %v873_v17 = vpop.permute.xlu0 %872  ;;  %v871_v61 = vpop.permute.xlu1 %870 }
 0x8c8   :  { %v879_v62 = vsel %vm478_vm12, %v873_v17, 0.0  ;;  %v876_v0 = vsel %vm478_vm12, %v871_v61, 0.0 }
 0x8c9   :  { %880 = vadd.xlane.f32.xlu0 %v879_v62  ;;  %877 = vadd.xlane.f32.xlu1 %v876_v0 }
 0x956   :  { %v881_v7 = vpop.xlane.xlu0 %880  ;;  %v878_v3 = vpop.xlane.xlu1 %877 }
 0x957   :  { %v883_v5 = vadd.f32 %v881_v7, %v1477_v10  ;;  %v882_v2 = vadd.f32 %v878_v3, %v1475_v9 }
 0x959   :  { %v1035_v34 = vmul.f32 -1.442695, %v883_v5  ;;  %v1034_v14 = vmul.f32 -1.442695, %v882_v2 }
 0x95b   :  { %1119 = vpow2.f32 %v1035_v34 }
 0x95c   :  { %1121 = vpow2.f32 %v1034_v14 }
 0x965   :  { %v1120_v24 = vpop.eup %1119 }
 0x966   :  { %v1122_v6 = vpop.eup %1121  ;;  %v891_v8 = vadd.f32 1.0, %v1120_v24 }
 0x967   :  { %v890_v11 = vadd.f32 1.0, %v1122_v6 }
 0x968   :  { %1123 = vrcp.f32 %v891_v8 }
 0x969   :  { %1125 = vrcp.f32 %v890_v11 }
 0x972   :  { %v1124_v13 = vpop.eup %1123 }
 0x973   :  { %v1126_v16 = vpop.eup %1125  ;;  %903 = vperm.xlu1 %1068, %v1124_v13  }
 0x974   :  { %898 = vperm.xlu0 %1067, %v1126_v16  }
 0x977   :  { %1069 = vset.pattern.permute.xlu1 %v1250_v37 }
 0x9f2   :  { %v904_v19 = vpop.permute.xlu1 %903 }
 0x9f3   :  { %v899_v10 = vpop.permute.xlu0 %898  ;;  %v907_v9 = vmul.f32 %v1597_v55, %v904_v19  ;;  %v1128_v55 = vld [vmem:[#allocation2 + $0x10] sm:$0xf] }
 0x9f4   :  { %v906_v20 = vmul.f32 %v1595_v53, %v899_v10  ;;  %v1127_v53 = vld [vmem:[#allocation2] sm:$0xf] }
 0x9f5   :  { %v909_v22 = vsel %vm149_vm15, %v907_v9, 0.0 }
 0x9f6   :  { %v908_v39 = vsel %vm149_vm15, %v906_v20, 0.0 }
 0x9f7   :  { %v910_v36 = vadd.f32 %v909_v22, %v908_v39 }
 0x9f9   :  { %v911_v23 = vrot.slane %v910_v36, 4 }
 0x9fb   :  { %v912_v28 = vadd.f32 %v911_v23, %v910_v36 }
 0x9fd   :  { %v913_v47 = vrot.slane %v912_v28, 2 }
 0x9ff   :  { %v914_v26 = vadd.f32 %v913_v47, %v912_v28 }
 0xa01   :  { %v915_v25 = vrot.slane %v914_v26, 1 }
 0xa03   :  { %v916_v27 = vadd.f32 %v915_v25, %v914_v26 }
 0xa05   :  { %918 = vrot.lane.b32.xlu1 %v916_v27, %s1248_s1 }
 0xa09   :  { %529 = vperm.xlu1 %1069, %v1652_v45  }
 0xa0d   :  { %978 = vrot.lane.b32.xlu1 %v974_v15, %s1238_s29 }
 0xa11   :  { %582 = vrot.lane.b32.xlu1 %v1127_v53, %s1238_s29 }
 0xa15   :  { %586 = vrot.lane.b32.xlu1 %v1128_v55, %s1238_s29 }
 0xa77   :  { %v919_v18 = vpop.permute.xlu1 %918 }
 0xa78   :  { %v921_v35 = vmul.f32 %v919_v18, %v1652_v45 }
 0xa7a   :  { %v922_v41 = vpack.c.bf16 %v921_v35, %v921_v35 }
 0xa7c   :  { %924 = vrot.lane.b32.xlu0 %v922_v41, %s1249_s10 }
 0xa80   :  { %976 = vrot.lane.b32.xlu0 %v973_v54, %s1238_s29 }
 0xa84   :  { %980 = vrot.lane.b32.xlu0 %v975_v44, %s1238_s29 }
 0xa88   :  { %584 = vrot.lane.b32.xlu0 %v1129_v42, %s1238_s29  ;;  %v530_v46 = vpop.permute.xlu1 %529 }
 0xa89   :  { %v573_v33 = vadd.f32 %v1702_v12, %v530_v46  ;;  %v575_v57 = vadd.f32 %v1704_v31, %v530_v46 }
 0xa8c   :  { %v979_v45 = vpop.permute.xlu1 %978 }
 0xa90   :  { %v583_v60 = vpop.permute.xlu1 %582 }
 0xa94   :  { %v587_v63 = vpop.permute.xlu1 %586 }
 0xaee   :  { %v925_v40 = vpop.permute.xlu0 %924 }
 0xaef   :  { %1036 = vmatmul.mubr.msk.bf16.vlgmr.msra.gmra.mrb[4].mxu0 %vm149_vm15, %v925_v40 }
 0xaf2   :  { %v977_v49 = vpop.permute.xlu0 %976 }
 0xaf3   :  { %v982_v32 = vsel %vm244_vm0, %v977_v49, %v979_v45 }
 0xaf6   :  { %v981_v50 = vpop.permute.xlu0 %980 }
 0xaf7   :  { %v983_v43 = vsel %vm244_vm0, %v979_v45, %v981_v50 }
 0xafa   :  { %v585_v29 = vpop.permute.xlu0 %584 }
 0xafb   :  { %v589_v51 = vsel %vm244_vm0, %v583_v60, %v585_v29  ;;  %v590_v1 = vsel %vm244_vm0, %v585_v29, %v587_v63 }
 0xafc   :  { %v593_v59 = vadd.f32 %v589_v51, %v573_v33  ;;  %v594_v61 = vadd.f32 %v590_v1, %v575_v57 }
 0xbc2   :  { %v963_v30 = vpop.f32.mrb[4].mxu0 }
 0xbc3   :  { %v964_v38 = vadd.f32 %v963_v30, %v530_v46  ;;  %v965_v21 = vpop.f32.mrb[5].mxu0 }
 0xbc4   :  { %v966_v52 = vadd.f32 %v965_v21, %v530_v46  ;;  %v967_v48 = vpop.f32.mrb[6].mxu0 }
 0xbc5   :  { %v986_v56 = vadd.f32 %v982_v32, %v964_v38  ;;  %v968_v4 = vpop.f32.mrb[7].mxu0 }
 0xbc6   :  { %v987_v58 = vadd.f32 %v983_v43, %v966_v52 }
 0xbc7   :  { %v990_v17 = vrot.slane %v986_v56, 4 }
 0xbc8   :  { %v991_v62 = vrot.slane %v987_v58, 4 }
 0xbc9   :  { %v994_v0 = vsel %vm308_vm7, %v593_v59, %v990_v17 }
 0xbca   :  { %v995_v7 = vsel %vm308_vm7, %v594_v61, %v991_v62  ;;  %996 = vst [vmem:[#allocation8] sm:$0xff] %v994_v0 }
 0xbcb   :  { %997 = vst [vmem:[#allocation8 + $0x8] sm:$0xff] %v995_v7 }
 0xbcc   :  { %1207 = shalt.err (!%p1204_p0)
}
 0xbcd   :  { %s1208_s15 = scalar_lea.hbm %s1766_s3, 256 }
 0xbce   :  { %p1209_p1 = scmp.ne.s32.totalorder %s1766_s3, %s1208_s15  ;;  %p1212_p2 = scmp.lt.u32.totalorder %s1208_s15, %s1766_s3 }
 0xbd0   :  { %p1214_p3 = pnand %p1212_p2, %p1209_p1 }
 0xbd2   :  { %1217 = shalt.err (!%p1214_p3)
}
 0xbd3   :  { %1007 = dma.vmem_to_hbm [thread:$0]  %s1005_s11, 256, %s1766_s3, [#allocation4]  }
 0xbd4   :  { %1222 = dma.done.wait [#allocation4], 256  }
 0xbd5   :  { %1223 = vsyncadd [#allocation4], 4294967040 }
 0xbd6   :  { %1011 = vsyncpa [#allocation3], 1 }
 0xbd7   :  { %1012 = vsyncpa [#allocation6], 1 }
 0xbd8   :  { %1013 = vsyncpa [#allocation4], 1 }

</bundles_post_ra>
